<compile_context>
chip_gen: v7x
topology: tpu7x:2x2x1
jax: 0.10.0
libtpu: 0.0.40
codegen_flags: <defaults>
</compile_context>

<pallas_src>
import numpy as np
from functools import partial

import jax
import jax.numpy as jnp
from jax.experimental import pallas as pl
from jax.experimental.pallas import tpu as pltpu

CHANNEL_CNN = 128
CHANNEL_FC = 256
KSIZE = 4
N_IN_CH = 5
SEQ_LEN = 8
CONV_T = SEQ_LEN - KSIZE + 1                 # 5
P = N_IN_CH * CHANNEL_CNN * CONV_T           # 3200 (PyTorch flatten width)
KPAD = 48                                    # 40 real input scalars, padded
A_PAD = 128                                  # lane-padded fc3 width


def actor_kernel(x_ref, bias_ref, wconv_ref, w12_ref, out_ref):
    """conv bank (1 MXU dot) -> ReLU -> fc1 -> ReLU -> fc3 -> softmax."""
    a_out = out_ref.shape[1]

    # All five Conv1d(1,128,4) applications + all 5 output positions collapse
    # into a single (TB,48)@(48,3200) MXU dot (weight built in pack_params).
    xb = x_ref[...].astype(jnp.bfloat16)
    conv = jnp.dot(xb, wconv_ref[...], preferred_element_type=jnp.float32)
    h = jnp.maximum(conv + bias_ref[0:1, :], 0.0)                  # (TB, 3200)

    # fc1: single K=3200 bf16 MXU dot, f32 accumulation.
    a1 = jnp.dot(h.astype(jnp.bfloat16), w12_ref[0:P, :],
                 preferred_element_type=jnp.float32)               # (TB, 256)
    h1 = jnp.maximum(a1 + bias_ref[1:2, 0:CHANNEL_FC], 0.0)

    # fc3 against the transposed tail rows of the packed bf16 weight buffer
    # (pad actions: zero weight rows + -1e30 bias -> exactly zero probability).
    w2t = w12_ref[P:P + A_PAD, :]                                  # (128, 256)
    logits = jax.lax.dot_general(
        h1.astype(jnp.bfloat16), w2t, (((1,), (1,)), ((), ())),
        preferred_element_type=jnp.float32) + bias_ref[2:3, 0:A_PAD]

    m = jnp.max(logits, axis=1, keepdims=True)
    e = jnp.exp(logits - m)                                        # pads -> 0
    s = jnp.sum(e, axis=1, keepdims=True)
    probs = e * pl.reciprocal(s, approx=False)                     # EUP slot
    out_ref[...] = probs[:, :a_out]


@partial(jax.jit, static_argnames=("n_actions",))
def actor_forward(x, packed, n_actions):
    wconv, w12, bias = packed
    B = x.shape[0]
    x_flat = x.reshape(B, N_IN_CH * SEQ_LEN)                       # (B, 40)

    # Batch tiling: single full-batch block for small B; 256-row tiles (well
    # within v7x's 64 MiB VMEM) with VMEM-resident weights for deployment B.
    if B <= 512:
        tb, bp = B, B
    else:
        tb = 256
        bp = ((B + tb - 1) // tb) * tb
    nb = bp // tb
    x_aug = jnp.zeros((bp, KPAD), jnp.float32).at[:B, :N_IN_CH * SEQ_LEN].set(x_flat)

    sem = ("parallel",) if nb > 1 else ("arbitrary",)
    probs = pl.pallas_call(
        actor_kernel,
        out_shape=jax.ShapeDtypeStruct((bp, n_actions), jnp.float32),
        grid=(nb,),
        in_specs=[
            pl.BlockSpec((tb, KPAD), lambda i: (i, 0)),            # activations
            pl.BlockSpec((3, P), lambda i: (0, 0)),                # biases (resident)
            pl.BlockSpec((KPAD, P), lambda i: (0, 0)),             # conv W (resident)
            pl.BlockSpec((P + A_PAD, CHANNEL_FC), lambda i: (0, 0)),  # fc1+fc3 (resident)
        ],
        out_specs=pl.BlockSpec((tb, n_actions), lambda i: (i, 0)),
        compiler_params=pltpu.CompilerParams(dimension_semantics=sem),
    )(x_aug, bias, wconv, w12)
    return probs if bp == B else probs[:B]


def init_params(key, action_space):
    """Deterministic PyTorch-style uniform init (U[-1/sqrt(fan_in), +])."""
    ks = jax.random.split(key, 8)

    def u(k, shape, fan_in):
        bound = 1.0 / np.sqrt(fan_in)
        return jax.random.uniform(k, shape, jnp.float32, -bound, bound)

    conv1_w = u(ks[0], (CHANNEL_CNN, 1, KSIZE), 1 * KSIZE)
    conv1_b = u(ks[1], (CHANNEL_CNN,), 1 * KSIZE)
    conv2_w = u(ks[2], (CHANNEL_CNN, 1, KSIZE), 1 * KSIZE)
    conv2_b = u(ks[3], (CHANNEL_CNN,), 1 * KSIZE)
    incoming = N_IN_CH * CHANNEL_CNN * CONV_T                       # 3200
    fc1_w = u(ks[4], (CHANNEL_FC, incoming), incoming)
    fc1_b = u(ks[5], (CHANNEL_FC,), incoming)
    fc3_w = u(ks[6], (action_space, CHANNEL_FC), CHANNEL_FC)
    fc3_b = u(ks[7], (action_space,), CHANNEL_FC)
    # NOTE: the original forward uses conv1 for channel 0 and conv2 for
    # channels 1..4 (conv3/4/5 exist but are unused) -- reproduced exactly.
    return dict(conv1_w=conv1_w, conv1_b=conv1_b, conv2_w=conv2_w,
                conv2_b=conv2_b, fc1_w=fc1_w, fc1_b=fc1_b,
                fc3_w=fc3_w, fc3_b=fc3_b)


def pack_params(p):
    """One-time host-side repack into 3 kernel buffers (no per-call work)."""
    conv1_w = np.asarray(p['conv1_w'], np.float32)   # (128,1,4)
    conv2_w = np.asarray(p['conv2_w'], np.float32)
    conv1_b = np.asarray(p['conv1_b'], np.float32)
    conv2_b = np.asarray(p['conv2_b'], np.float32)
    fc1_w = np.asarray(p['fc1_w'], np.float32)       # (256, 3200)
    fc1_b = np.asarray(p['fc1_b'], np.float32)
    fc3_w = np.asarray(p['fc3_w'], np.float32)       # (A, 256)
    fc3_b = np.asarray(p['fc3_b'], np.float32)
    n_act = fc3_w.shape[0]
    assert n_act <= A_PAD

    # Dense conv-bank weight: row r = c_in*8 + s (flattened input index),
    # col q = c*640 + co*5 + t (the exact PyTorch flatten/concat order).
    wbig = np.zeros((N_IN_CH, SEQ_LEN, N_IN_CH, CHANNEL_CNN, CONV_T), np.float32)
    for c in range(N_IN_CH):
        wc = conv1_w if c == 0 else conv2_w
        for t in range(CONV_T):
            for k in range(KSIZE):
                wbig[c, t + k, c, :, t] = wc[:, 0, k]
    wconv = np.zeros((KPAD, P), np.float32)
    wconv[:N_IN_CH * SEQ_LEN] = wbig.reshape(N_IN_CH * SEQ_LEN, P)

    # Conv bias laid out in the same q order.
    bc = np.zeros((N_IN_CH, CHANNEL_CNN, CONV_T), np.float32)
    bc[0] = conv1_b[:, None]
    bc[1:] = conv2_b[None, :, None]

    bias = np.zeros((3, P), np.float32)
    bias[0] = bc.reshape(P)
    bias[1, :CHANNEL_FC] = fc1_b
    bias[2, :A_PAD] = -1e30            # pad actions -> exp() == 0
    bias[2, :n_act] = fc3_b

    # fc1 (3200,256) and fc3^T (<=128,256) packed into ONE bf16 buffer.
    w12 = np.zeros((P + A_PAD, CHANNEL_FC), np.float32)
    w12[:P] = fc1_w.T
    w12[P:P + n_act] = fc3_w

    return (jnp.asarray(wconv, jnp.bfloat16),
            jnp.asarray(w12, jnp.bfloat16),
            jnp.asarray(bias, jnp.float32))


def actor_reference(x, p):
    """Pure-JAX f32 reference replicating the PyTorch forward exactly."""
    B = x.shape[0]
    with jax.default_matmul_precision('highest'):
        outs = []
        for c in range(N_IN_CH):
            w = p['conv1_w'] if c == 0 else p['conv2_w']   # (128, 1, 4)
            b = p['conv1_b'] if c == 0 else p['conv2_b']
            conv = jnp.stack(
                [x[:, c, t:t + KSIZE] @ w[:, 0, :].T for t in range(CONV_T)],
                axis=2) + b[None, :, None]                 # (B, 128, 5)
            outs.append(jnp.maximum(conv, 0.0).reshape(B, -1))
        flat = jnp.concatenate(outs, axis=1)               # (B, 3200)
        h1 = jnp.maximum(flat @ p['fc1_w'].T + p['fc1_b'], 0.0)
        logits = h1 @ p['fc3_w'].T + p['fc3_b']
    return jax.nn.softmax(logits, axis=1)


if __name__ == "__main__":
    key = jax.random.PRNGKey(0)
    kx, kp = jax.random.split(key)

    batch = 2
    action_space = 8
    x = jax.random.normal(kx, (batch, N_IN_CH, SEQ_LEN), jnp.float32)

    params = init_params(kp, action_space)
    packed = pack_params(params)

    out = jax.block_until_ready(actor_forward(x, packed, n_actions=action_space))
    ref = jax.block_until_ready(actor_reference(x, params))

    # bf16 weights with f32 MXU accumulation vs an f32 reference.
    np.testing.assert_allclose(np.asarray(out), np.asarray(ref),
                               rtol=3e-3, atol=3e-3)
    # softmax rows sum to 1 (pad actions carry exactly zero probability).
    np.testing.assert_allclose(np.asarray(out).sum(axis=1),
                               np.ones(batch), rtol=1e-5, atol=1e-5)
    print("KERNEL_OK")
</pallas_src>

<mosaic_0001>
module attributes {stable_mosaic.version = 11 : i64} {
  func.func @actor_kernel(%arg0: i32, %arg1: memref<2x48xf32, #tpu.memory_space<vmem>>, %arg2: memref<3x3200xf32, #tpu.memory_space<vmem>>, %arg3: memref<48x3200xbf16, #tpu.memory_space<vmem>>, %arg4: memref<3328x256xbf16, #tpu.memory_space<vmem>>, %arg5: memref<2x8xf32, #tpu.memory_space<vmem>>) attributes {dimension_semantics = [#tpu.dimension_semantics<arbitrary>], iteration_bounds = array<i64: 1>, scalar_prefetch = 0 : i64, scratch_operands = 0 : i64, tpu.core_type = #tpu.core_type<tc>, window_params = [{transform_indices = @transform_0, window_bounds = array<i64: 2, 48>}, {pipeline_mode = #tpu.pipeline_mode<synchronous>, transform_indices = @transform_1, window_bounds = array<i64: 3, 3200>}, {pipeline_mode = #tpu.pipeline_mode<synchronous>, transform_indices = @transform_2, window_bounds = array<i64: 48, 3200>}, {pipeline_mode = #tpu.pipeline_mode<synchronous>, transform_indices = @transform_3, window_bounds = array<i64: 3328, 256>}, {transform_indices = @transform_4, window_bounds = array<i64: 2, 8>}]} {
    %c0 = arith.constant 0 : index
    %c0_0 = arith.constant 0 : index
    %0 = vector.load %arg1[%c0, %c0_0] : memref<2x48xf32, #tpu.memory_space<vmem>>, vector<2x48xf32>
    %1 = arith.truncf %0 : vector<2x48xf32> to vector<2x48xbf16>
    %c0_1 = arith.constant 0 : index
    %c0_2 = arith.constant 0 : index
    %2 = vector.load %arg3[%c0_1, %c0_2] : memref<48x3200xbf16, #tpu.memory_space<vmem>>, vector<48x3200xbf16>
    %cst = arith.constant dense<0.000000e+00> : vector<2x3200xf32>
    %3 = tpu.matmul %1, %2, %cst {dimension_numbers = #tpu.dot_dimension_numbers<[1], [0], [0], [1], [0, 0, 1, 1], [], []>} : vector<2x48xbf16>, vector<48x3200xbf16>, vector<2x3200xf32> -> vector<2x3200xf32>
    %c0_3 = arith.constant 0 : index
    %c0_4 = arith.constant 0 : index
    %4 = vector.load %arg2[%c0_3, %c0_4] : memref<3x3200xf32, #tpu.memory_space<vmem>>, vector<1x3200xf32>
    %5 = vector.broadcast %4 : vector<1x3200xf32> to vector<2x3200xf32>
    %6 = arith.addf %3, %5 : vector<2x3200xf32>
    %cst_5 = arith.constant 0.000000e+00 : f32
    %7 = vector.broadcast %cst_5 : f32 to vector<2x3200xf32>
    %8 = arith.maximumf %6, %7 : vector<2x3200xf32>
    %9 = arith.truncf %8 : vector<2x3200xf32> to vector<2x3200xbf16>
    %c0_6 = arith.constant 0 : index
    %c0_7 = arith.constant 0 : index
    %10 = vector.load %arg4[%c0_6, %c0_7] : memref<3328x256xbf16, #tpu.memory_space<vmem>>, vector<3200x256xbf16>
    %cst_8 = arith.constant dense<0.000000e+00> : vector<2x256xf32>
    %11 = tpu.matmul %9, %10, %cst_8 {dimension_numbers = #tpu.dot_dimension_numbers<[1], [0], [0], [1], [0, 0, 1, 1], [], []>} : vector<2x3200xbf16>, vector<3200x256xbf16>, vector<2x256xf32> -> vector<2x256xf32>
    %c1 = arith.constant 1 : index
    %c0_9 = arith.constant 0 : index
    %12 = vector.load %arg2[%c1, %c0_9] : memref<3x3200xf32, #tpu.memory_space<vmem>>, vector<1x256xf32>
    %13 = vector.broadcast %12 : vector<1x256xf32> to vector<2x256xf32>
    %14 = arith.addf %11, %13 : vector<2x256xf32>
    %cst_10 = arith.constant 0.000000e+00 : f32
    %15 = vector.broadcast %cst_10 : f32 to vector<2x256xf32>
    %16 = arith.maximumf %14, %15 : vector<2x256xf32>
    %c3200 = arith.constant 3200 : index
    %c0_11 = arith.constant 0 : index
    %17 = vector.load %arg4[%c3200, %c0_11] : memref<3328x256xbf16, #tpu.memory_space<vmem>>, vector<128x256xbf16>
    %18 = arith.truncf %16 : vector<2x256xf32> to vector<2x256xbf16>
    %cst_12 = arith.constant dense<0.000000e+00> : vector<2x128xf32>
    %19 = tpu.matmul %18, %17, %cst_12 {dimension_numbers = #tpu.dot_dimension_numbers<[1], [1], [0], [0], [0, 0, 1, 0], [], []>} : vector<2x256xbf16>, vector<128x256xbf16>, vector<2x128xf32> -> vector<2x128xf32>
    %c2 = arith.constant 2 : index
    %c0_13 = arith.constant 0 : index
    %20 = vector.load %arg2[%c2, %c0_13] : memref<3x3200xf32, #tpu.memory_space<vmem>>, vector<1x128xf32>
    %21 = vector.broadcast %20 : vector<1x128xf32> to vector<2x128xf32>
    %22 = arith.addf %19, %21 : vector<2x128xf32>
    %cst_14 = arith.constant dense<0xFF800000> : vector<2xf32>
    %23 = vector.multi_reduction <maximumf>, %22, %cst_14 [1] : vector<2x128xf32> to vector<2xf32>
    %24 = vector.shape_cast %23 : vector<2xf32> to vector<2x1xf32>
    %25 = vector.broadcast %24 : vector<2x1xf32> to vector<2x128xf32>
    %26 = arith.subf %22, %25 : vector<2x128xf32>
    %27 = math.exp %26 : vector<2x128xf32>
    %cst_15 = arith.constant dense<0.000000e+00> : vector<2xf32>
    %28 = vector.multi_reduction <add>, %27, %cst_15 [1] : vector<2x128xf32> to vector<2xf32>
    %29 = vector.shape_cast %28 : vector<2xf32> to vector<2x1xf32>
    %30 = tpu.reciprocal %29 : vector<2x1xf32> -> vector<2x1xf32>
    %31 = vector.broadcast %30 : vector<2x1xf32> to vector<2x128xf32>
    %32 = arith.mulf %27, %31 : vector<2x128xf32>
    %33 = vector.extract_strided_slice %32 {offsets = [0, 0], sizes = [2, 8], strides = [1, 1]} : vector<2x128xf32> to vector<2x8xf32>
    %c0_16 = arith.constant 0 : index
    %c0_17 = arith.constant 0 : index
    %34 = vector.load %arg5[%c0_16, %c0_17] : memref<2x8xf32, #tpu.memory_space<vmem>>, vector<2x8xf32>
    tpu.vector_store %arg5[%c0_16, %c0_17], %33 {strides = array<i32>} : memref<2x8xf32, #tpu.memory_space<vmem>>, vector<2x8xf32>,
    return
  }
  func.func @transform_0(%arg0: i32) -> (i32, i32) {
    %c0_i32 = arith.constant 0 : i32
    %c0_i32_0 = arith.constant 0 : i32
    return %arg0, %c0_i32 : i32, i32
  }
  func.func @transform_1(%arg0: i32) -> (i32, i32) {
    %c0_i32 = arith.constant 0 : i32
    %c0_i32_0 = arith.constant 0 : i32
    %c0_i32_1 = arith.constant 0 : i32
    return %c0_i32, %c0_i32_0 : i32, i32
  }
  func.func @transform_2(%arg0: i32) -> (i32, i32) {
    %c0_i32 = arith.constant 0 : i32
    %c0_i32_0 = arith.constant 0 : i32
    %c0_i32_1 = arith.constant 0 : i32
    return %c0_i32, %c0_i32_0 : i32, i32
  }
  func.func @transform_3(%arg0: i32) -> (i32, i32) {
    %c0_i32 = arith.constant 0 : i32
    %c0_i32_0 = arith.constant 0 : i32
    %c0_i32_1 = arith.constant 0 : i32
    return %c0_i32, %c0_i32_0 : i32, i32
  }
  func.func @transform_4(%arg0: i32) -> (i32, i32) {
    %c0_i32 = arith.constant 0 : i32
    %c0_i32_0 = arith.constant 0 : i32
    return %arg0, %c0_i32 : i32, i32
  }
}

</mosaic_0001>

<bundles_post_ra>
// kernel: actor_forward.1
= control target key start
LH: loop header
LB: loop body
LE: loop exit
PB: predicated region body
PF: predicated region fallthrough
CT: control target
= control target key end

     0   :  { %9 = vsyncpa [#allocation3], 0  ;;  %s6039_s0 = inlined_call_operand.vmem [shape: f32[2,48], index: 0, kind: input, shape index: {}]   ;;  %s6040_s1 = inlined_call_operand.hbm [shape: f32[3,3200], index: 1, kind: input, shape index: {}]   ;;  %s6041_s2 = inlined_call_operand.hbm [shape: bf16[48,3200], index: 2, kind: input, shape index: {}]   ;;  %s6042_s3 = inlined_call_operand.hbm [shape: bf16[3328,256], index: 3, kind: input, shape index: {}]   ;;  %s6043_s4 = inlined_call_operand.hbm [shape: f32[2,8], index: 4, kind: output, shape index: {}]  }
   0x1   :  { %10 = vsyncpa [#allocation6], 0 }
   0x2   :  { %11 = vsyncpa [#allocation4], 0  ;;  %s5770_s15 = smov [#allocation5]   ;;  %s5676_s19 = scalar_lea.hbm %s6041_s2, 9600 }
   0x3   :  { %s29_s16 = sshll.u32 %s5770_s15, 4  ;;  %p5677_p0 = scmp.ne.s32.totalorder %s6041_s2, %s5676_s19  ;;  %s30_s16 = int_to_ptr.vmem [resolvable:$true] %s29_s16 }
   0x4   :  { %p5680_p1 = scmp.lt.u32.totalorder %s5676_s19, %s6041_s2 }
   0x6   :  { %p5682_p2 = pnand %p5680_p1, %p5677_p0 }
   0x8   :  { %5685 = shalt.err (!%p5682_p2)
}
   0x9   :  { %s5686_s24 = scalar_lea.vmem %s30_s16, 9600  ;;  %p5691_p4 = scmp.lt.s32.totalorder %s30_s16, %s30_s16 }
   0xa   :  { %p5687_p3 = scmp.ne.s32.totalorder %s30_s16, %s5686_s24  ;;  %p5692_p5 = scmp.lt.s32.totalorder %s5686_s24, %s5686_s24 }
   0xc   :  { %p5693_p6 = por %p5692_p5, %p5691_p4 }
   0xe   :  { %p5694_p7 = pnand %p5693_p6, %p5687_p3 }
  0x10   :  { %5697 = shalt.err (!%p5694_p7)
}
  0x11   :  { %s5771_s25 = smov 1600   ;;  %s5772_s26 = smov 100  }
  0x12   :  { %35 = dma.hbm_to_vmem [thread:$0]  %s6041_s2, 9600, %s30_s16, [#allocation6], %s5771_s25, %s5771_s25, %s5772_s26  }
  0x13   :  { %s5773_s29 = smov [#allocation2]   ;;  %s5774_s5 = smov [#allocation7]  }
  0x14   :  { %s20_s30 = sshll.u32 %s5773_s29, 4  ;;  %s41_s6 = sshll.u32 %s5774_s5, 4  ;;  %s21_s30 = int_to_ptr.vmem [resolvable:$true] %s20_s30  ;;  %s42_s6 = int_to_ptr.vmem [resolvable:$true] %s41_s6 }
  0x15   :  { %s5698_s9 = scalar_lea.hbm %s6040_s1, 1600 }
  0x16   :  { %p5699_p8 = scmp.ne.s32.totalorder %s6040_s1, %s5698_s9  ;;  %p5702_p9 = scmp.lt.u32.totalorder %s5698_s9, %s6040_s1 }
  0x18   :  { %p5704_p10 = pnand %p5702_p9, %p5699_p8 }
  0x1a   :  { %5707 = shalt.err (!%p5704_p10)
}
  0x1b   :  { %s5708_s2 = scalar_lea.vmem %s21_s30, 1600  ;;  %p5713_p12 = scmp.lt.s32.totalorder %s21_s30, %s21_s30 }
  0x1c   :  { %p5709_p11 = scmp.ne.s32.totalorder %s21_s30, %s5708_s2  ;;  %p5714_p13 = scmp.lt.s32.totalorder %s5708_s2, %s5708_s2 }
  0x1e   :  { %p5715_p0 = por %p5714_p13, %p5713_p12 }
  0x20   :  { %p5716_p1 = pnand %p5715_p0, %p5709_p11 }
  0x22   :  { %5719 = shalt.err (!%p5716_p1)
}
  0x23   :  { %23 = dma.hbm_to_vmem [thread:$0]  %s6040_s1, 1600, %s21_s30, [#allocation3]  }
  0x24   :  { %s5720_s18 = scalar_lea.hbm %s6042_s3, 53248 }
  0x25   :  { %p5721_p2 = scmp.ne.s32.totalorder %s6042_s3, %s5720_s18  ;;  %p5724_p3 = scmp.lt.u32.totalorder %s5720_s18, %s6042_s3 }
  0x27   :  { %p5726_p4 = pnand %p5724_p3, %p5721_p2 }
  0x29   :  { %5729 = shalt.err (!%p5726_p4)
}
  0x2a   :  { %s5730_s23 = scalar_lea.vmem %s42_s6, 53248  ;;  %p5735_p6 = scmp.lt.s32.totalorder %s42_s6, %s42_s6 }
  0x2b   :  { %p5731_p5 = scmp.ne.s32.totalorder %s42_s6, %s5730_s23  ;;  %p5736_p7 = scmp.lt.s32.totalorder %s5730_s23, %s5730_s23 }
  0x2d   :  { %p5737_p8 = por %p5736_p7, %p5735_p6 }
  0x2f   :  { %p5738_p9 = pnand %p5737_p8, %p5731_p5 }
  0x31   :  { %5741 = shalt.err (!%p5738_p9)
}
  0x32   :  { %s5775_s1 = smov 128   ;;  %s5776_s24 = smov 8  }
  0x33   :  { %47 = dma.hbm_to_vmem [thread:$0]  %s6042_s3, 53248, %s42_s6, [#allocation6], %s5775_s1, %s5775_s1, %s5776_s24  }
  0x34   :  { %5764 = dma.done.wait [#allocation3], 1600  }
  0x35   :  { %5765 = vsyncadd [#allocation3], 4294965696 }
  0x36   :  { %5766 = dma.done.wait [#allocation6], 62848  }
  0x37   :  { %5767 = vsyncadd [#allocation6], 4294904448  ;;  %v5777_v0 = vmov 0   ;;  %v4935_v1 = vld [vmem:[#allocation5 + $0x4] ss:$100 sps:$4 sm:$0xff]   ;;  %vm652_vm0 = vcmask 392192  }
  0x38   :  { %688 = vmatprep.mubr.bf16.mxu0 %v5777_v0  ;;  %811 = vmatprep.mubr.bf16.mxu1 %v5777_v0  ;;  %v4937_v2 = vld [vmem:[#allocation5 + $0x1c] ss:$100 sps:$4 sm:$0xff]   ;;  %v4941_v5 = vld [vmem:[#allocation5 + $0xcc] ss:$100 sps:$4 sm:$0xff]   ;;  %v4943_v6 = vld [vmem:[#allocation5 + $0xe4] ss:$100 sps:$4 sm:$0xff]  }
  0x39   :  { %656 = vmatprep.subr.bf16.mxu0 %v4935_v1  ;;  %v4939_v3 = vld [vmem:[#allocation5] ss:$100 sps:$4 sm:$0xff]   ;;  %v4940_v4 = vld [vmem:[#allocation5 + $0x18] ss:$100 sps:$4 sm:$0xff]   ;;  %779 = vmatprep.subr.bf16.mxu1 %v4937_v2  ;;  %v4945_v7 = vld [vmem:[#allocation5 + $0xc8] ss:$100 sps:$4 sm:$0xff]  }
  0x3a   :  { %657 = vmatpush1.bf16.msra.mxu0 %v4939_v3  ;;  %780 = vmatpush1.bf16.msra.mxu1 %v4940_v4  ;;  %v4946_v8 = vld [vmem:[#allocation5 + $0xe0] ss:$100 sps:$4 sm:$0xff]   ;;  %v4947_v9 = vld [vmem:[#allocation5 + $0x194] ss:$100 sps:$4 sm:$0xff]   ;;  %v4949_v10 = vld [vmem:[#allocation5 + $0x1ac] ss:$100 sps:$4 sm:$0xff]  }
  0x3b   :  { %658 = vmatprep.subr.bf16.mxu0 %v4941_v5  ;;  %781 = vmatprep.subr.bf16.mxu1 %v4943_v6  ;;  %v4951_v11 = vld [vmem:[#allocation5 + $0x190] ss:$100 sps:$4 sm:$0xff]   ;;  %v4952_v12 = vld [vmem:[#allocation5 + $0x1a8] ss:$100 sps:$4 sm:$0xff]   ;;  %v58_v13 = vld [vmem:[%s6039_s0] sm:$0x3] }
  0x3c   :  { %v4955_v14 = vld [vmem:[#allocation5 + $0x2c] ss:$100 sps:$4 sm:$0xff]   ;;  %v5847_v15 = vpack.c.bf16 %v58_v13, %v58_v13  ;;  %v4958_v17 = vld [vmem:[#allocation5 + $0xf4] ss:$100 sps:$4 sm:$0xff]   ;;  %v4961_v22 = vld [vmem:[#allocation5 + $0x1bc] ss:$100 sps:$4 sm:$0xff]  }
  0x3d   :  { %v4953_v16 = vld [vmem:[#allocation5 + $0x28] ss:$100 sps:$4 sm:$0xff]   ;;  %v4967_v20 = vld [vmem:[#allocation5 + $0xd4] ss:$100 sps:$4 sm:$0xff]   ;;  %v4970_v24 = vld [vmem:[#allocation5 + $0x19c] ss:$100 sps:$4 sm:$0xff]  }
  0x3e   :  { %659 = vmatpush1.bf16.msra.mxu0 %v4945_v7  ;;  %782 = vmatpush1.bf16.msra.mxu1 %v4946_v8  ;;  %v4964_v18 = vld [vmem:[#allocation5 + $0xc] ss:$100 sps:$4 sm:$0xff]   ;;  %v4959_v25 = vld [vmem:[#allocation5 + $0x1b8] ss:$100 sps:$4 sm:$0xff]   ;;  %v4979_v31 = vld [vmem:[#allocation5 + $0x1a4] ss:$100 sps:$4 sm:$0xff]  }
  0x3f   :  { %660 = vmatprep.subr.bf16.mxu0 %v4947_v9  ;;  %783 = vmatprep.subr.bf16.mxu1 %v4949_v10  ;;  %v4962_v19 = vld [vmem:[#allocation5 + $0x8] ss:$100 sps:$4 sm:$0xff]   ;;  %v4956_v21 = vld [vmem:[#allocation5 + $0xf0] ss:$100 sps:$4 sm:$0xff]   ;;  %v4968_v26 = vld [vmem:[#allocation5 + $0x198] ss:$100 sps:$4 sm:$0xff]  }
  0x40   :  { %v4965_v23 = vld [vmem:[#allocation5 + $0xd0] ss:$100 sps:$4 sm:$0xff]   ;;  %v4976_v29 = vld [vmem:[#allocation5 + $0xdc] ss:$100 sps:$4 sm:$0xff]   ;;  %v4982_v35 = vld [vmem:[#allocation5 + $0x24] ss:$100 sps:$4 sm:$0xff]  }
  0x41   :  { %v4973_v27 = vld [vmem:[#allocation5 + $0x14] ss:$100 sps:$4 sm:$0xff]   ;;  %v5006_v33 = vld [vmem:[#allocation5 + $0x3c] ss:$100 sps:$4 sm:$0xff]   ;;  %v5012_v36 = vld [vmem:[#allocation5 + $0x104] ss:$100 sps:$4 sm:$0xff]  }
  0x42   :  { %661 = vmatpush1.bf16.msra.mxu0 %v4951_v11  ;;  %784 = vmatpush1.bf16.msra.mxu1 %v4952_v12  ;;  %v4971_v28 = vld [vmem:[#allocation5 + $0x10] ss:$100 sps:$4 sm:$0xff]   ;;  %v4974_v30 = vld [vmem:[#allocation5 + $0xd8] ss:$100 sps:$4 sm:$0xff]   ;;  %v4977_v34 = vld [vmem:[#allocation5 + $0x1a0] ss:$100 sps:$4 sm:$0xff]  }
  0x43   :  { %861 = vmatprep.subr.bf16.mxu1 %v4955_v14  ;;  %697 = vmatprep.subr.bf16.mxu0 %v4964_v18  ;;  %v5004_v32 = vld [vmem:[#allocation5 + $0x38] ss:$100 sps:$4 sm:$0xff]   ;;  %v5010_v37 = vld [vmem:[#allocation5 + $0x100] ss:$100 sps:$4 sm:$0xff]   ;;  %v5018_v38 = vld [vmem:[#allocation5 + $0x1cc] ss:$100 sps:$4 sm:$0xff]  }
  0x44   :  { %v4980_v39 = vld [vmem:[#allocation5 + $0x20] ss:$100 sps:$4 sm:$0xff]   ;;  %v4985_v40 = vld [vmem:[#allocation5 + $0xec] ss:$100 sps:$4 sm:$0xff]   ;;  %v4988_v44 = vld [vmem:[#allocation5 + $0x1b4] ss:$100 sps:$4 sm:$0xff]  }
  0x45   :  { %4434 = vmatmul.mubr.msk.bf16.vlgmr.msra.gmra.mrb[0].mxu0 %vm652_vm0, %v5847_v15  ;;  %4437 = vmatmul.mubr.msk.bf16.vlgmr.msra.gmra.mrb[0].mxu1 %vm652_vm0, %v5847_v15  ;;  %v5016_v41 = vld [vmem:[#allocation5 + $0x1c8] ss:$100 sps:$4 sm:$0xff]   ;;  %v5031_v46 = vld [vmem:[#allocation5 + $0x114] ss:$100 sps:$4 sm:$0xff]   ;;  %v5035_v50 = vld [vmem:[#allocation5 + $0x1dc] ss:$100 sps:$4 sm:$0xff]  }
  0x46   :  { %862 = vmatpush1.bf16.msra.mxu1 %v4953_v16  ;;  %893 = vmatprep.mubr.bf16.mxu1 %v5777_v0  ;;  %v5027_v42 = vld [vmem:[#allocation5 + $0x4c] ss:$100 sps:$4 sm:$0xff]   ;;  %v4991_v48 = vld [vmem:[#allocation5 + $0x34] ss:$100 sps:$4 sm:$0xff]   ;;  %v4994_v52 = vld [vmem:[#allocation5 + $0xfc] ss:$100 sps:$4 sm:$0xff]  }
  0x47   :  { %863 = vmatprep.subr.bf16.mxu1 %v4958_v17  ;;  %698 = vmatpush1.bf16.msra.mxu0 %v4962_v19  ;;  %v4983_v43 = vld [vmem:[#allocation5 + $0xe8] ss:$100 sps:$4 sm:$0xff]   ;;  %v4986_v47 = vld [vmem:[#allocation5 + $0x1b0] ss:$100 sps:$4 sm:$0xff]   ;;  %v5033_v53 = vld [vmem:[#allocation5 + $0x1d8] ss:$100 sps:$4 sm:$0xff]  }
  0x48   :  { %729 = vmatprep.mubr.bf16.mxu0 %v5777_v0  ;;  %699 = vmatprep.subr.bf16.mxu0 %v4967_v20  ;;  %v5025_v45 = vld [vmem:[#allocation5 + $0x48] ss:$100 sps:$4 sm:$0xff]   ;;  %v5029_v49 = vld [vmem:[#allocation5 + $0x110] ss:$100 sps:$4 sm:$0xff]   ;;  %v5039_v54 = vld [vmem:[#allocation5 + $0x5c] ss:$100 sps:$4 sm:$0xff]  }
  0x49   :  { %v4989_v51 = vld [vmem:[#allocation5 + $0x30] ss:$100 sps:$4 sm:$0xff]   ;;  %v4992_v55 = vld [vmem:[#allocation5 + $0xf8] ss:$100 sps:$4 sm:$0xff]   ;;  %v4997_v56 = vld [vmem:[#allocation5 + $0x1c4] ss:$100 sps:$4 sm:$0xff]  }
  0x4a   :  { %864 = vmatpush1.bf16.msra.mxu1 %v4956_v21  ;;  %v5037_v57 = vld [vmem:[#allocation5 + $0x58] ss:$100 sps:$4 sm:$0xff]   ;;  %v5045_v58 = vld [vmem:[#allocation5 + $0x124] ss:$100 sps:$4 sm:$0xff]   ;;  %v5051_v62 = vld [vmem:[#allocation5 + $0x1ec] ss:$100 sps:$4 sm:$0xff]  }
  0x4b   :  { %865 = vmatprep.subr.bf16.mxu1 %v4961_v22  ;;  %700 = vmatpush1.bf16.msra.mxu0 %v4965_v23  ;;  %v4995_v59 = vld [vmem:[#allocation5 + $0x1c0] ss:$100 sps:$4 sm:$0xff]   ;;  %v5003_v1 = vld [vmem:[#allocation5 + $0x10c] ss:$100 sps:$4 sm:$0xff]   ;;  %v5009_v5 = vld [vmem:[#allocation5 + $0x1d4] ss:$100 sps:$4 sm:$0xff]  }
  0x4c   :  { %701 = vmatprep.subr.bf16.mxu0 %v4970_v24  ;;  %v5000_v60 = vld [vmem:[#allocation5 + $0x44] ss:$100 sps:$4 sm:$0xff]   ;;  %v5058_v6 = vld [vmem:[#allocation7 + $0x500] ss:$8 sps:$4 sm:$0xff]   ;;  %v5066_v7 = vld [vmem:[#allocation7 + $0x514] ss:$8 sps:$4 sm:$0xff]  }
  0x4d   :  { %v5043_v61 = vld [vmem:[#allocation5 + $0x120] ss:$100 sps:$4 sm:$0xff]   ;;  %v5049_v2 = vld [vmem:[#allocation5 + $0x1e8] ss:$100 sps:$4 sm:$0xff]   ;;  %v5007_v8 = vld [vmem:[#allocation5 + $0x1d0] ss:$100 sps:$4 sm:$0xff]  }
  0x4e   :  { %866 = vmatpush1.bf16.msra.mxu1 %v4959_v25  ;;  %v4998_v63 = vld [vmem:[#allocation5 + $0x40] ss:$100 sps:$4 sm:$0xff]   ;;  %v5001_v4 = vld [vmem:[#allocation5 + $0x108] ss:$100 sps:$4 sm:$0xff]   ;;  %v5015_v9 = vld [vmem:[#allocation5 + $0x54] ss:$100 sps:$4 sm:$0xff]  }
  0x4f   :  { %702 = vmatpush1.bf16.msra.mxu0 %v4968_v26  ;;  %943 = vmatprep.subr.bf16.mxu1 %v5006_v33  ;;  %v5060_v3 = vld [vmem:[#allocation7 + $0x504] ss:$8 sps:$4 sm:$0xff]   ;;  %v5064_v10 = vld [vmem:[#allocation7 + $0x510] ss:$8 sps:$4 sm:$0xff]   ;;  %v5070_v14 = vld [vmem:[#allocation7 + $0x520] ss:$8 sps:$4 sm:$0xff]  }
  0x50   :  { %738 = vmatprep.subr.bf16.mxu0 %v4973_v27  ;;  %v5072_v11 = vld [vmem:[#allocation7 + $0x524] ss:$8 sps:$4 sm:$0xff]   ;;  %v5013_v12 = vld [vmem:[#allocation5 + $0x50] ss:$100 sps:$4 sm:$0xff]   ;;  %v5082_v22 = vld [vmem:[#allocation7 + $0x540] ss:$8 sps:$4 sm:$0xff]  }
  0x51   :  { %4439 = vmatmul.mubr.msk.bf16.vlgmr.msra.gmra.mrb[4].mxu1 %vm652_vm0, %v5847_v15  ;;  %v5021_v13 = vld [vmem:[#allocation5 + $0x11c] ss:$100 sps:$4 sm:$0xff]   ;;  %v5078_v16 = vld [vmem:[#allocation7 + $0x534] ss:$8 sps:$4 sm:$0xff]   ;;  %v5024_v18 = vld [vmem:[#allocation5 + $0x1e4] ss:$100 sps:$4 sm:$0xff]  }
  0x52   :  { %975 = vmatprep.mubr.bf16.mxu1 %v5777_v0  ;;  %4435 = vmatmul.mubr.msk.bf16.vlgmr.msra.gmra.mrb[4].mxu0 %vm652_vm0, %v5847_v15  ;;  %v5019_v17 = vld [vmem:[#allocation5 + $0x118] ss:$100 sps:$4 sm:$0xff]   ;;  %v5076_v19 = vld [vmem:[#allocation7 + $0x530] ss:$8 sps:$4 sm:$0xff]   ;;  %v5022_v21 = vld [vmem:[#allocation5 + $0x1e0] ss:$100 sps:$4 sm:$0xff]  }
  0x53   :  { %739 = vmatpush1.bf16.msra.mxu0 %v4971_v28  ;;  %770 = vmatprep.mubr.bf16.mxu0 %v5777_v0  ;;  %v5084_v20 = vld [vmem:[#allocation7 + $0x544] ss:$8 sps:$4 sm:$0xff]   ;;  %v5090_v24 = vld [vmem:[#allocation7 + $0x554] ss:$8 sps:$4 sm:$0xff]   ;;  %v5088_v25 = vld [vmem:[#allocation7 + $0x550] ss:$8 sps:$4 sm:$0xff]  }
  0x54   :  { %740 = vmatprep.subr.bf16.mxu0 %v4976_v29  ;;  %944 = vmatpush1.bf16.msra.mxu1 %v5004_v32  ;;  %v5028_v23 = vld [vmem:[#allocation5 + $0x60] ss:$100 sps:$4 sm:$0xff]   ;;  %v5778_v27 = vmov 0.0   ;;  %v5032_v28 = vld [vmem:[#allocation5 + $0x128] ss:$100 sps:$4 sm:$0xff]   ;;  %vm5779_vm1 = vmmov 0  }
  0x55   :  { %945 = vmatprep.subr.bf16.mxu1 %v5012_v36  ;;  %v5096_v26 = vld [vmem:[#allocation7 + $0x564] ss:$8 sps:$4 sm:$0xff]   ;;  %v5094_v29 = vld [vmem:[#allocation7 + $0x560] ss:$8 sps:$4 sm:$0xff]   ;;  %v5100_v33 = vld [vmem:[#allocation7 + $0x570] ss:$8 sps:$4 sm:$0xff]  }
  0x56   :  { %v5042_v32 = vld [vmem:[#allocation7 + $0x4] ss:$8 sps:$4 sm:$0xff]   ;;  %v5048_v36 = vld [vmem:[#allocation7 + $0x14] ss:$8 sps:$4 sm:$0xff]   ;;  %vm4329_vm2 = vcmask 1041408   ;;  %s5780_s0 = smov [#allocation8]  }
  0x57   :  { %741 = vmatpush1.bf16.msra.mxu0 %v4974_v30  ;;  %v5102_v30 = vld [vmem:[#allocation7 + $0x574] ss:$8 sps:$4 sm:$0xff]   ;;  %s4349_s28 = sshll.u32 %s5780_s0, 4  ;;  %vm4341_vm3 = vcmask 58368   ;;  %s4350_s28 = int_to_ptr.vmem [resolvable:$true] %s4349_s28 }
  0x58   :  { %742 = vmatprep.subr.bf16.mxu0 %v4979_v31  ;;  %946 = vmatpush1.bf16.msra.mxu1 %v5010_v37  ;;  %v5036_v31 = vld [vmem:[#allocation5 + $0x1f0] ss:$100 sps:$4 sm:$0xff]   ;;  %v5106_v37 = vld [vmem:[#allocation7 + $0x580] ss:$8 sps:$4 sm:$0xff]   ;;  %s5742_s29 = scalar_lea.vmem %s4350_s28, 32  ;;  %p5747_p11 = scmp.lt.s32.totalorder %s4350_s28, %s4350_s28 }
  0x59   :  { %947 = vmatprep.subr.bf16.mxu1 %v5018_v38  ;;  %v5046_v38 = vld [vmem:[#allocation7 + $0x10] ss:$8 sps:$4 sm:$0xff]   ;;  %p5743_p10 = scmp.ne.s32.totalorder %s4350_s28, %s5742_s29  ;;  %p5748_p12 = scmp.lt.s32.totalorder %s5742_s29, %s5742_s29 }
  0x5b   :  { %743 = vmatpush1.bf16.msra.mxu0 %v4977_v34  ;;  %v5040_v34 = vld [vmem:[#allocation7] ss:$8 sps:$4 sm:$0xff]   ;;  %p5749_p13 = por %p5748_p12, %p5747_p11 }
  0x5c   :  { %820 = vmatprep.subr.bf16.mxu0 %v4982_v35  ;;  %948 = vmatpush1.bf16.msra.mxu1 %v5016_v41  ;;  %v5108_v35 = vld [vmem:[#allocation7 + $0x584] ss:$8 sps:$4 sm:$0xff]   ;;  %v5112_v41 = vld [vmem:[#allocation7 + $0x590] ss:$8 sps:$4 sm:$0xff]  }
  0x5d   :  { %1025 = vmatprep.subr.bf16.mxu1 %v5027_v42  ;;  %v5052_v42 = vld [vmem:[#allocation7 + $0x20] ss:$8 sps:$4 sm:$0xff]   ;;  %p5750_p0 = pnand %p5749_p13, %p5743_p10 }
  0x5e   :  { %4436 = vmatmul.mubr.msk.bf16.vlgmr.msra.gmra.mrb[8].mxu0 %vm652_vm0, %v5847_v15 }
  0x5f   :  { %821 = vmatpush1.bf16.msra.mxu0 %v4980_v39  ;;  %852 = vmatprep.mubr.bf16.mxu0 %v5777_v0  ;;  %v5114_v39 = vld [vmem:[#allocation7 + $0x594] ss:$8 sps:$4 sm:$0xff]  }
  0x60   :  { %822 = vmatprep.subr.bf16.mxu0 %v4985_v40  ;;  %4441 = vmatmul.mubr.msk.bf16.vlgmr.msra.gmra.mrb[8].mxu1 %vm652_vm0, %v5847_v15  ;;  %v5054_v40 = vld [vmem:[#allocation7 + $0x24] ss:$8 sps:$4 sm:$0xff]  }
  0x61   :  { %1026 = vmatpush1.bf16.msra.mxu1 %v5025_v45  ;;  %1057 = vmatprep.mubr.bf16.mxu1 %v5777_v0  ;;  %v5118_v45 = vld [vmem:[#allocation7 + $0x5a0] ss:$8 sps:$4 sm:$0xff]  }
  0x62   :  { %1027 = vmatprep.subr.bf16.mxu1 %v5031_v46  ;;  %v5126_v46 = vld [vmem:[#allocation7 + $0x5b4] ss:$8 sps:$4 sm:$0xff]  }
  0x63   :  { %823 = vmatpush1.bf16.msra.mxu0 %v4983_v43  ;;  %v5120_v43 = vld [vmem:[#allocation7 + $0x5a4] ss:$8 sps:$4 sm:$0xff]  }
  0x64   :  { %824 = vmatprep.subr.bf16.mxu0 %v4988_v44  ;;  %v5057_v44 = vld [vmem:[#allocation7 + $0x34] ss:$8 sps:$4 sm:$0xff]  }
  0x65   :  { %1028 = vmatpush1.bf16.msra.mxu1 %v5029_v49  ;;  %v5124_v49 = vld [vmem:[#allocation7 + $0x5b0] ss:$8 sps:$4 sm:$0xff]  }
  0x66   :  { %1029 = vmatprep.subr.bf16.mxu1 %v5035_v50  ;;  %v5061_v50 = vld [vmem:[#allocation7 + $0x40] ss:$8 sps:$4 sm:$0xff]  }
  0x67   :  { %825 = vmatpush1.bf16.msra.mxu0 %v4986_v47  ;;  %v5055_v47 = vld [vmem:[#allocation7 + $0x30] ss:$8 sps:$4 sm:$0xff]  }
  0x68   :  { %902 = vmatprep.subr.bf16.mxu0 %v4991_v48  ;;  %v5063_v48 = vld [vmem:[#allocation7 + $0x44] ss:$8 sps:$4 sm:$0xff]  }
  0x69   :  { %1030 = vmatpush1.bf16.msra.mxu1 %v5033_v53  ;;  %v5067_v53 = vld [vmem:[#allocation7 + $0x50] ss:$8 sps:$4 sm:$0xff]  }
  0x6a   :  { %4438 = vmatmul.mubr.msk.bf16.vlgmr.msra.gmra.mrb[12].mxu0 %vm652_vm0, %v5847_v15  ;;  %1107 = vmatprep.subr.bf16.mxu1 %v5039_v54  ;;  %v5138_v54 = vld [vmem:[#allocation7 + $0x5d4] ss:$8 sps:$4 sm:$0xff]  }
  0x6b   :  { %903 = vmatpush1.bf16.msra.mxu0 %v4989_v51  ;;  %934 = vmatprep.mubr.bf16.mxu0 %v5777_v0  ;;  %v5069_v51 = vld [vmem:[#allocation7 + $0x54] ss:$8 sps:$4 sm:$0xff]  }
  0x6c   :  { %904 = vmatprep.subr.bf16.mxu0 %v4994_v52  ;;  %4443 = vmatmul.mubr.msk.bf16.vlgmr.msra.gmra.mrb[12].mxu1 %vm652_vm0, %v5847_v15  ;;  %v5130_v52 = vld [vmem:[#allocation7 + $0x5c0] ss:$8 sps:$4 sm:$0xff]  }
  0x6d   :  { %1108 = vmatpush1.bf16.msra.mxu1 %v5037_v57  ;;  %1139 = vmatprep.mubr.bf16.mxu1 %v5777_v0  ;;  %v5073_v57 = vld [vmem:[#allocation7 + $0x60] ss:$8 sps:$4 sm:$0xff]  }
  0x6e   :  { %1109 = vmatprep.subr.bf16.mxu1 %v5045_v58  ;;  %v5144_v58 = vld [vmem:[#allocation7 + $0x5e4] ss:$8 sps:$4 sm:$0xff]  }
  0x6f   :  { %905 = vmatpush1.bf16.msra.mxu0 %v4992_v55  ;;  %v5075_v55 = vld [vmem:[#allocation7 + $0x64] ss:$8 sps:$4 sm:$0xff]  }
  0x70   :  { %906 = vmatprep.subr.bf16.mxu0 %v4997_v56  ;;  %v5136_v56 = vld [vmem:[#allocation7 + $0x5d0] ss:$8 sps:$4 sm:$0xff]  }
  0x71   :  { %1110 = vmatpush1.bf16.msra.mxu1 %v5043_v61  ;;  %v5079_v61 = vld [vmem:[#allocation7 + $0x70] ss:$8 sps:$4 sm:$0xff]  }
  0x72   :  { %1111 = vmatprep.subr.bf16.mxu1 %v5051_v62  ;;  %v5150_v62 = vld [vmem:[#allocation7 + $0x5f4] ss:$8 sps:$4 sm:$0xff]  }
  0x73   :  { %907 = vmatpush1.bf16.msra.mxu0 %v4995_v59  ;;  %v5081_v59 = vld [vmem:[#allocation7 + $0x74] ss:$8 sps:$4 sm:$0xff]  }
  0x74   :  { %984 = vmatprep.subr.bf16.mxu0 %v5000_v60  ;;  %v5142_v60 = vld [vmem:[#allocation7 + $0x5e0] ss:$8 sps:$4 sm:$0xff]  }
  0x75   :  { %1112 = vmatpush1.bf16.msra.mxu1 %v5049_v2  ;;  %v5156_v2 = vld [vmem:[#allocation7 + $0x604] ss:$8 sps:$4 sm:$0xff]  }
  0x76   :  { %4440 = vmatmul.mubr.msk.bf16.vlgmr.msra.gmra.mrb[16].mxu0 %vm652_vm0, %v5847_v15  ;;  %3856 = vmatprep.subr.bf16.mxu1 %v5060_v3  ;;  %v5085_v3 = vld [vmem:[#allocation7 + $0x80] ss:$8 sps:$4 sm:$0xff]  }
  0x77   :  { %985 = vmatpush1.bf16.msra.mxu0 %v4998_v63  ;;  %1016 = vmatprep.mubr.bf16.mxu0 %v5777_v0  ;;  %v5087_v63 = vld [vmem:[#allocation7 + $0x84] ss:$8 sps:$4 sm:$0xff]  }
  0x78   :  { %986 = vmatprep.subr.bf16.mxu0 %v5003_v1  ;;  %4445 = vmatmul.mubr.msk.bf16.vlgmr.msra.gmra.mrb[16].mxu1 %vm652_vm0, %v5847_v15  ;;  %v5148_v1 = vld [vmem:[#allocation7 + $0x5f0] ss:$8 sps:$4 sm:$0xff]  }
  0x79   :  { %3857 = vmatpush1.bf16.msra.mxu1 %v5058_v6  ;;  %v5099_v6 = vld [vmem:[#allocation7 + $0xa4] ss:$8 sps:$4 sm:$0xff]  }
  0x7a   :  { %3858 = vmatprep.subr.bf16.mxu1 %v5066_v7  ;;  %v5097_v7 = vld [vmem:[#allocation7 + $0xa0] ss:$8 sps:$4 sm:$0xff]  }
  0x7b   :  { %987 = vmatpush1.bf16.msra.mxu0 %v5001_v4  ;;  %v5093_v4 = vld [vmem:[#allocation7 + $0x94] ss:$8 sps:$4 sm:$0xff]  }
  0x7c   :  { %988 = vmatprep.subr.bf16.mxu0 %v5009_v5  ;;  %v5091_v5 = vld [vmem:[#allocation7 + $0x90] ss:$8 sps:$4 sm:$0xff]  }
  0x7d   :  { %3859 = vmatpush1.bf16.msra.mxu1 %v5064_v10  ;;  %v5111_v10 = vld [vmem:[#allocation7 + $0xc4] ss:$8 sps:$4 sm:$0xff]  }
  0x7e   :  { %3860 = vmatprep.subr.bf16.mxu1 %v5072_v11  ;;  %v5109_v11 = vld [vmem:[#allocation7 + $0xc0] ss:$8 sps:$4 sm:$0xff]  }
  0x7f   :  { %989 = vmatpush1.bf16.msra.mxu0 %v5007_v8  ;;  %v5105_v8 = vld [vmem:[#allocation7 + $0xb4] ss:$8 sps:$4 sm:$0xff]  }
  0x80   :  { %1066 = vmatprep.subr.bf16.mxu0 %v5015_v9  ;;  %v5103_v9 = vld [vmem:[#allocation7 + $0xb0] ss:$8 sps:$4 sm:$0xff]  }
  0x81   :  { %3861 = vmatpush1.bf16.msra.mxu1 %v5070_v14  ;;  %v5123_v14 = vld [vmem:[#allocation7 + $0xe4] ss:$8 sps:$4 sm:$0xff]  }
  0x82   :  { %4442 = vmatmul.mubr.msk.bf16.vlgmr.msra.gmra.mrb[20].mxu0 %vm652_vm0, %v5847_v15  ;;  %3862 = vmatprep.subr.bf16.mxu1 %v5078_v16  ;;  %v5121_v16 = vld [vmem:[#allocation7 + $0xe0] ss:$8 sps:$4 sm:$0xff]  }
  0x83   :  { %1067 = vmatpush1.bf16.msra.mxu0 %v5013_v12  ;;  %1098 = vmatprep.mubr.bf16.mxu0 %v5777_v0  ;;  %v5117_v12 = vld [vmem:[#allocation7 + $0xd4] ss:$8 sps:$4 sm:$0xff]  }
  0x84   :  { %1068 = vmatprep.subr.bf16.mxu0 %v5021_v13  ;;  %v5115_v13 = vld [vmem:[#allocation7 + $0xd0] ss:$8 sps:$4 sm:$0xff]  }
  0x85   :  { %3863 = vmatpush1.bf16.msra.mxu1 %v5076_v19  ;;  %v5135_v19 = vld [vmem:[#allocation7 + $0x104] ss:$8 sps:$4 sm:$0xff]  }
  0x86   :  { %3864 = vmatprep.subr.bf16.mxu1 %v5084_v20  ;;  %v149_v20 = vlaneseq }
  0x87   :  { %1069 = vmatpush1.bf16.msra.mxu0 %v5019_v17  ;;  %v5129_v17 = vld [vmem:[#allocation7 + $0xf4] ss:$8 sps:$4 sm:$0xff]  }
  0x88   :  { %1070 = vmatprep.subr.bf16.mxu0 %v5024_v18  ;;  %v5127_v18 = vld [vmem:[#allocation7 + $0xf0] ss:$8 sps:$4 sm:$0xff]  }
  0x89   :  { %3865 = vmatpush1.bf16.msra.mxu1 %v5082_v22  ;;  %v5887_v22 = vld [vmem:[#allocation2] ss:$4 sm:$0xff] }
  0x8a   :  { %3866 = vmatprep.subr.bf16.mxu1 %v5090_v24 }
  0x8b   :  { %1071 = vmatpush1.bf16.msra.mxu0 %v5022_v21  ;;  %v5885_v21 = vshrl.u32 %v149_v20, 7 }
  0x8c   :  { %4868 = vmatprep.subr.bf16.mxu0 %v5778_v27 }
  0x8d   :  { %3867 = vmatpush1.bf16.msra.mxu1 %v5088_v25  ;;  %v5893_v24 = vsub.s32 1, %v5885_v21 }
  0x8e   :  { %4444 = vmatmul.mubr.msk.bf16.vlgmr.msra.gmra.mrb[24].mxu0 %vm652_vm0, %v5847_v15  ;;  %3868 = vmatprep.subr.bf16.mxu1 %v5096_v26 }
  0x8f   :  { %4869 = vmatpush3.bf16.msra.mxu0 %v5028_v23  ;;  %4874 = vmatprep.mubr.msk.bf16.mxu0 %vm5779_vm1, %v5778_v27  ;;  %v5890_v23 = vsub.s32 0, %v5885_v21  ;;  %v156_v26 = vrot.slane %v5887_v22, %v5893_v24 }
  0x90   :  { %4870 = vmatprep.subr.bf16.mxu0 %v5778_v27 }
  0x91   :  { %3869 = vmatpush1.bf16.msra.mxu1 %v5094_v29  ;;  %v152_v25 = vrot.slane %v5887_v22, %v5890_v23 }
  0x92   :  { %3870 = vmatprep.subr.bf16.mxu1 %v5102_v30 }
  0x93   :  { %4871 = vmatpush3.bf16.msra.mxu0 %v5032_v28 }
  0x94   :  { %4872 = vmatprep.subr.bf16.mxu0 %v5778_v27 }
  0x95   :  { %3871 = vmatpush1.bf16.msra.mxu1 %v5100_v33 }
  0x96   :  { %3872 = vmatprep.subr.bf16.mxu1 %v5108_v35 }
  0x97   :  { %4873 = vmatpush3.bf16.msra.mxu0 %v5036_v31 }
  0x98   :  { %3651 = vmatprep.subr.bf16.mxu0 %v5042_v32 }
  0x99   :  { %3873 = vmatpush1.bf16.msra.mxu1 %v5106_v37 }
  0x9a   :  { %4875 = vmatmul.mubr.msk.bf16.vlgmr.msra.gmra.mrb[28].mxu0 %vm652_vm0, %v5847_v15  ;;  %3874 = vmatprep.subr.bf16.mxu1 %v5114_v39  ;;  %v5132_v15 = vld [vmem:[#allocation7 + $0x5c4] ss:$8 sps:$4 sm:$0xff]   ;;  %v5133_v39 = vld [vmem:[#allocation7 + $0x100] ss:$8 sps:$4 sm:$0xff]  }
  0x9b   :  { %3652 = vmatpush1.bf16.msra.mxu0 %v5040_v34 }
  0x9c   :  { %3653 = vmatprep.subr.bf16.mxu0 %v5048_v36 }
  0x9d   :  { %3875 = vmatpush1.bf16.msra.mxu1 %v5112_v41 }
  0x9e   :  { %3876 = vmatprep.subr.bf16.mxu1 %v5120_v43  ;;  %v5141_v43 = vld [vmem:[#allocation7 + $0x114] ss:$8 sps:$4 sm:$0xff]  }
  0x9f   :  { %3654 = vmatpush1.bf16.msra.mxu0 %v5046_v38 }
  0xa0   :  { %3655 = vmatprep.subr.bf16.mxu0 %v5054_v40  ;;  %v5903_v40 = vld [vmem:[#allocation2 + $0x20] ss:$4 sm:$0xff] }
  0xa1   :  { %3877 = vmatpush1.bf16.msra.mxu1 %v5118_v45  ;;  %v5909_v45 = vsub.s32 3, %v5885_v21 }
  0xa2   :  { %3878 = vmatprep.subr.bf16.mxu1 %v5126_v46 }
  0xa3   :  { %3656 = vmatpush1.bf16.msra.mxu0 %v5052_v42  ;;  %v5906_v42 = vsub.s32 2, %v5885_v21 }
  0xa4   :  { %3657 = vmatprep.subr.bf16.mxu0 %v5057_v44 }
  0xa5   :  { %3879 = vmatpush1.bf16.msra.mxu1 %v5124_v49  ;;  %v192_v46 = vrot.slane %v5903_v40, %v5906_v42  ;;  %v5147_v49 = vld [vmem:[#allocation7 + $0x124] ss:$8 sps:$4 sm:$0xff]  }
  0xa6   :  { %3880 = vmatprep.subr.bf16.mxu1 %v5132_v15 }
  0xa7   :  { %3658 = vmatpush1.bf16.msra.mxu0 %v5055_v47  ;;  %v5139_v47 = vld [vmem:[#allocation7 + $0x110] ss:$8 sps:$4 sm:$0xff]  }
  0xa8   :  { %3659 = vmatprep.subr.bf16.mxu0 %v5063_v48  ;;  %v196_v48 = vrot.slane %v5903_v40, %v5909_v45 }
  0xa9   :  { %3881 = vmatpush1.bf16.msra.mxu1 %v5130_v52 }
  0xaa   :  { %3882 = vmatprep.subr.bf16.mxu1 %v5138_v54 }
  0xab   :  { %3660 = vmatpush1.bf16.msra.mxu0 %v5061_v50  ;;  %v5145_v50 = vld [vmem:[#allocation7 + $0x120] ss:$8 sps:$4 sm:$0xff]  }
  0xac   :  { %3661 = vmatprep.subr.bf16.mxu0 %v5069_v51  ;;  %v164_v51 = vrot.slane %v5887_v22, %v5909_v45 }
  0xad   :  { %3883 = vmatpush1.bf16.msra.mxu1 %v5136_v56 }
  0xae   :  { %3884 = vmatprep.subr.bf16.mxu1 %v5144_v58 }
  0xaf   :  { %3662 = vmatpush1.bf16.msra.mxu0 %v5067_v53 }
  0xb0   :  { %3663 = vmatprep.subr.bf16.mxu0 %v5075_v55 }
  0xb1   :  { %3885 = vmatpush1.bf16.msra.mxu1 %v5142_v60 }
  0xb2   :  { %3886 = vmatprep.subr.bf16.mxu1 %v5150_v62  ;;  %v5151_v62 = vld [vmem:[#allocation7 + $0x130] ss:$8 sps:$4 sm:$0xff]  }
  0xb3   :  { %3664 = vmatpush1.bf16.msra.mxu0 %v5073_v57 }
  0xb4   :  { %3665 = vmatprep.subr.bf16.mxu0 %v5081_v59  ;;  %v5153_v59 = vld [vmem:[#allocation7 + $0x134] ss:$8 sps:$4 sm:$0xff]  }
  0xb5   :  { %3887 = vmatpush1.bf16.msra.mxu1 %v5148_v1 }
  0xb6   :  { %3897 = vmatprep.subr.bf16.mxu1 %v5156_v2  ;;  %v5154_v2 = vld [vmem:[#allocation7 + $0x600] ss:$8 sps:$4 sm:$0xff]  }
  0xb7   :  { %3666 = vmatpush1.bf16.msra.mxu0 %v5079_v61 }
  0xb8   :  { %3667 = vmatprep.subr.bf16.mxu0 %v5087_v63 }
  0xbb   :  { %3668 = vmatpush1.bf16.msra.mxu0 %v5085_v3 }
  0xbc   :  { %3669 = vmatprep.subr.bf16.mxu0 %v5093_v4 }
  0xbf   :  { %3670 = vmatpush1.bf16.msra.mxu0 %v5091_v5 }
  0xc0   :  { %3671 = vmatprep.subr.bf16.mxu0 %v5099_v6 }
  0xc3   :  { %3672 = vmatpush1.bf16.msra.mxu0 %v5097_v7  ;;  %v5159_v7 = vld [vmem:[#allocation7 + $0x144] ss:$8 sps:$4 sm:$0xff]  }
  0xc4   :  { %3673 = vmatprep.subr.bf16.mxu0 %v5105_v8  ;;  %v5162_v8 = vld [vmem:[#allocation7 + $0x614] ss:$8 sps:$4 sm:$0xff]  }
  0xc7   :  { %3674 = vmatpush1.bf16.msra.mxu0 %v5103_v9  ;;  %v5157_v9 = vld [vmem:[#allocation7 + $0x140] ss:$8 sps:$4 sm:$0xff]  }
  0xc8   :  { %3675 = vmatprep.subr.bf16.mxu0 %v5111_v10 }
  0xcb   :  { %3676 = vmatpush1.bf16.msra.mxu0 %v5109_v11  ;;  %v5160_v11 = vld [vmem:[#allocation7 + $0x610] ss:$8 sps:$4 sm:$0xff]  }
  0xcc   :  { %3677 = vmatprep.subr.bf16.mxu0 %v5117_v12  ;;  %v5165_v12 = vld [vmem:[#allocation7 + $0x154] ss:$8 sps:$4 sm:$0xff]  }
  0xcf   :  { %3678 = vmatpush1.bf16.msra.mxu0 %v5115_v13  ;;  %v5168_v13 = vld [vmem:[#allocation7 + $0x624] ss:$8 sps:$4 sm:$0xff]  }
  0xd0   :  { %3679 = vmatprep.subr.bf16.mxu0 %v5123_v14  ;;  %v5163_v14 = vld [vmem:[#allocation7 + $0x150] ss:$8 sps:$4 sm:$0xff]  }
  0xd3   :  { %3680 = vmatpush1.bf16.msra.mxu0 %v5121_v16  ;;  %v5166_v16 = vld [vmem:[#allocation7 + $0x620] ss:$8 sps:$4 sm:$0xff]  }
  0xd4   :  { %3681 = vmatprep.subr.bf16.mxu0 %v5129_v17 }
  0xd7   :  { %3682 = vmatpush1.bf16.msra.mxu0 %v5127_v18  ;;  %v5171_v18 = vld [vmem:[#allocation7 + $0x164] ss:$8 sps:$4 sm:$0xff]  }
  0xd8   :  { %3692 = vmatprep.subr.bf16.mxu0 %v5135_v19  ;;  %v5174_v19 = vld [vmem:[#allocation7 + $0x634] ss:$8 sps:$4 sm:$0xff]  }
 0x118   :  { %v690_v27 = vpop.f32.mrb[0].mxu0  ;;  %v5899_v28 = vpop.f32.mrb[0].mxu1 }
 0x119   :  { %v691_v29 = vadd.f32 %v690_v27, %v152_v25  ;;  %v692_v30 = vpop.f32.mrb[1].mxu0  ;;  %v5901_v31 = vpop.f32.mrb[1].mxu1  ;;  %v5169_v25 = vld [vmem:[#allocation7 + $0x160] ss:$8 sps:$4 sm:$0xff]  }
 0x11a   :  { %v693_v32 = vadd.f32 %v692_v30, %v156_v26  ;;  %v817_v33 = vpop.f32.mrb[2].mxu1  ;;  %v694_v34 = vpop.f32.mrb[2].mxu0  ;;  %v5172_v26 = vld [vmem:[#allocation7 + $0x630] ss:$8 sps:$4 sm:$0xff]   ;;  %v5177_v30 = vld [vmem:[#allocation7 + $0x174] ss:$8 sps:$4 sm:$0xff]  }
 0x11b   :  { %v1188_v35 = vmax.f32 %v691_v29, 0.0  ;;  %v818_v36 = vpop.f32.mrb[3].mxu1  ;;  %v695_v37 = vpop.f32.mrb[3].mxu0  ;;  %v5175_v34 = vld [vmem:[#allocation7 + $0x170] ss:$8 sps:$4 sm:$0xff]  }
 0x11c   :  { %v1189_v38 = vmax.f32 %v693_v32, 0.0  ;;  %v5180_v32 = vld [vmem:[#allocation7 + $0x644] ss:$8 sps:$4 sm:$0xff]  }
 0x11d   :  { %v1213_v41 = vpack.c.bf16 %v1188_v35, %v1188_v35  ;;  %v5178_v35 = vld [vmem:[#allocation7 + $0x640] ss:$8 sps:$4 sm:$0xff]  }
 0x11e   :  { %v1214_v44 = vpack.c.bf16 %v1189_v38, %v1189_v38 }
 0x120   :  { %3683 = vmatprep.mubr.bf16.mxu0 %v1214_v44  ;;  %v5184_v44 = vld [vmem:[#allocation7 + $0x650] ss:$8 sps:$4 sm:$0xff]  }
 0x121   :  { %3684 = vmatmul.mubr.bf16.vlgmr.msra.gmra.mrb[32].mxu0 %v1213_v41  ;;  %v5186_v41 = vld [vmem:[#allocation7 + $0x654] ss:$8 sps:$4 sm:$0xff]  }
 0x122   :  { %3693 = vmatpush1.bf16.msra.mxu0 %v5133_v39  ;;  %v5183_v39 = vld [vmem:[#allocation7 + $0x184] ss:$8 sps:$4 sm:$0xff]  }
 0x123   :  { %3694 = vmatprep.subr.bf16.mxu0 %v5141_v43  ;;  %v5181_v43 = vld [vmem:[#allocation7 + $0x180] ss:$8 sps:$4 sm:$0xff]  }
 0x124   :  { %v895_v15 = vpop.f32.mrb[4].mxu1 }
 0x125   :  { %v896_v52 = vadd.f32 %v895_v15, %v192_v46  ;;  %v897_v53 = vpop.f32.mrb[5].mxu1  ;;  %v5917_v56 = vpop.f32.mrb[4].mxu0 }
 0x126   :  { %v898_v54 = vadd.f32 %v897_v53, %v196_v48  ;;  %3695 = vmatpush1.bf16.msra.mxu0 %v5139_v47  ;;  %v899_v55 = vpop.f32.mrb[6].mxu1  ;;  %v733_v60 = vpop.f32.mrb[5].mxu0  ;;  %v5189_v47 = vld [vmem:[#allocation7 + $0x194] ss:$8 sps:$4 sm:$0xff]   ;;  %v5192_v48 = vld [vmem:[#allocation7 + $0x664] ss:$8 sps:$4 sm:$0xff]  }
 0x127   :  { %v1198_v57 = vmax.f32 %v896_v52, 0.0  ;;  %v900_v58 = vpop.f32.mrb[7].mxu1  ;;  %3696 = vmatprep.subr.bf16.mxu0 %v5147_v49  ;;  %v734_v63 = vadd.f32 %v733_v60, %v164_v51  ;;  %v735_v1 = vpop.f32.mrb[6].mxu0  ;;  %v5187_v51 = vld [vmem:[#allocation7 + $0x190] ss:$8 sps:$4 sm:$0xff]  }
 0x128   :  { %v1199_v61 = vmax.f32 %v898_v54, 0.0  ;;  %v736_v3 = vpop.f32.mrb[7].mxu0  ;;  %v5190_v52 = vld [vmem:[#allocation7 + $0x660] ss:$8 sps:$4 sm:$0xff]   ;;  %v5195_v53 = vld [vmem:[#allocation7 + $0x1a4] ss:$8 sps:$4 sm:$0xff]  }
 0x129   :  { %v1191_v5 = vmax.f32 %v734_v63, 0.0  ;;  %v1223_v6 = vpack.c.bf16 %v1198_v57, %v1198_v57  ;;  %v5198_v54 = vld [vmem:[#allocation7 + $0x674] ss:$8 sps:$4 sm:$0xff]   ;;  %v5196_v60 = vld [vmem:[#allocation7 + $0x670] ss:$8 sps:$4 sm:$0xff]  }
 0x12a   :  { %v1224_v4 = vpack.c.bf16 %v1199_v61, %v1199_v61  ;;  %3697 = vmatpush1.bf16.msra.mxu0 %v5145_v50  ;;  %v5936_v61 = vsub.s32 5, %v5885_v21  ;;  %v5201_v63 = vld [vmem:[#allocation7 + $0x1b4] ss:$8 sps:$4 sm:$0xff]   ;;  %v5204_v1 = vld [vmem:[#allocation7 + $0x684] ss:$8 sps:$4 sm:$0xff]  }
 0x12b   :  { %3698 = vmatprep.subr.bf16.mxu0 %v5153_v59  ;;  %v1216_v10 = vpack.c.bf16 %v1191_v5, %v1191_v5  ;;  %v5193_v59 = vld [vmem:[#allocation7 + $0x1a0] ss:$8 sps:$4 sm:$0xff]   ;;  %v5199_v3 = vld [vmem:[#allocation7 + $0x1b0] ss:$8 sps:$4 sm:$0xff]  }
 0x12c   :  { %3888 = vmatprep.mubr.bf16.mxu1 %v1224_v4  ;;  %v5202_v4 = vld [vmem:[#allocation7 + $0x680] ss:$8 sps:$4 sm:$0xff]  }
 0x12d   :  { %3889 = vmatmul.mubr.bf16.vlgmr.msra.gmra.mrb[20].mxu1 %v1223_v6  ;;  %3724 = vmatprep.mubr.bf16.mxu0 %v1216_v10  ;;  %v5207_v6 = vld [vmem:[#allocation7 + $0x1c4] ss:$8 sps:$4 sm:$0xff]  }
 0x12e   :  { %3699 = vmatpush1.bf16.msra.mxu0 %v5151_v62  ;;  %3898 = vmatpush1.bf16.msra.mxu1 %v5154_v2  ;;  %v204_v2 = vrot.slane %v5903_v40, %v5936_v61 }
 0x12f   :  { %3700 = vmatprep.subr.bf16.mxu0 %v5159_v7  ;;  %3899 = vmatprep.subr.bf16.mxu1 %v5162_v8  ;;  %v5210_v7 = vld [vmem:[#allocation7 + $0x694] ss:$8 sps:$4 sm:$0xff]  }
 0x131   :  { %v5919_v17 = vpop.f32.mrb[8].mxu0 }
 0x132   :  { %3701 = vmatpush1.bf16.msra.mxu0 %v5157_v9  ;;  %3900 = vmatpush1.bf16.msra.mxu1 %v5160_v11  ;;  %v5921_v20 = vpop.f32.mrb[9].mxu0 }
 0x133   :  { %3702 = vmatprep.subr.bf16.mxu0 %v5165_v12  ;;  %3901 = vmatprep.subr.bf16.mxu1 %v5168_v13  ;;  %v776_v27 = vpop.f32.mrb[10].mxu0  ;;  %v5923_v33 = vpop.f32.mrb[8].mxu1  ;;  %v5205_v12 = vld [vmem:[#allocation7 + $0x1c0] ss:$8 sps:$4 sm:$0xff]   ;;  %v5208_v13 = vld [vmem:[#allocation7 + $0x690] ss:$8 sps:$4 sm:$0xff]  }
 0x134   :  { %v777_v29 = vpop.f32.mrb[11].mxu0  ;;  %v5925_v36 = vpop.f32.mrb[9].mxu1 }
 0x135   :  { %v981_v37 = vpop.f32.mrb[10].mxu1  ;;  %v5211_v29 = vld [vmem:[#allocation7 + $0x1d0] ss:$8 sps:$4 sm:$0xff]  }
 0x136   :  { %3703 = vmatpush1.bf16.msra.mxu0 %v5163_v14  ;;  %3902 = vmatpush1.bf16.msra.mxu1 %v5166_v16  ;;  %v982_v38 = vpop.f32.mrb[11].mxu1  ;;  %v5213_v16 = vld [vmem:[#allocation7 + $0x1d4] ss:$8 sps:$4 sm:$0xff]  }
 0x137   :  { %3704 = vmatprep.subr.bf16.mxu0 %v5171_v18  ;;  %3903 = vmatprep.subr.bf16.mxu1 %v5174_v19  ;;  %v5216_v18 = vld [vmem:[#allocation7 + $0x6a4] ss:$8 sps:$4 sm:$0xff]   ;;  %v5222_v37 = vld [vmem:[#allocation7 + $0x6b4] ss:$8 sps:$4 sm:$0xff]   ;;  %v172_v38 = vrot.slane %v5887_v22, %v5936_v61 }
 0x13a   :  { %3705 = vmatpush1.bf16.msra.mxu0 %v5169_v25  ;;  %3904 = vmatpush1.bf16.msra.mxu1 %v5172_v26 }
 0x13b   :  { %3706 = vmatprep.subr.bf16.mxu0 %v5177_v30  ;;  %3905 = vmatprep.subr.bf16.mxu1 %v5180_v32  ;;  %v5214_v30 = vld [vmem:[#allocation7 + $0x6a0] ss:$8 sps:$4 sm:$0xff]  }
 0x13d   :  { %v5927_v46 = vpop.f32.mrb[12].mxu0 }
 0x13e   :  { %3707 = vmatpush1.bf16.msra.mxu0 %v5175_v34  ;;  %3906 = vmatpush1.bf16.msra.mxu1 %v5178_v35  ;;  %v5929_v49 = vpop.f32.mrb[13].mxu0  ;;  %v160_v34 = vrot.slane %v5887_v22, %v5906_v42  ;;  %v5219_v35 = vld [vmem:[#allocation7 + $0x1e4] ss:$8 sps:$4 sm:$0xff]  }
 0x13f   :  { %3708 = vmatprep.subr.bf16.mxu0 %v5183_v39  ;;  %3907 = vmatprep.subr.bf16.mxu1 %v5186_v41  ;;  %v858_v15 = vpop.f32.mrb[14].mxu0  ;;  %v5931_v55 = vpop.f32.mrb[12].mxu1  ;;  %v5217_v39 = vld [vmem:[#allocation7 + $0x1e0] ss:$8 sps:$4 sm:$0xff]   ;;  %v5220_v41 = vld [vmem:[#allocation7 + $0x6b0] ss:$8 sps:$4 sm:$0xff]  }
 0x140   :  { %v859_v50 = vpop.f32.mrb[15].mxu0  ;;  %v5933_v57 = vpop.f32.mrb[13].mxu1  ;;  %v5223_v15 = vld [vmem:[#allocation7 + $0x1f0] ss:$8 sps:$4 sm:$0xff]  }
 0x141   :  { %v1063_v58 = vpop.f32.mrb[14].mxu1  ;;  %v5226_v50 = vld [vmem:[#allocation7 + $0x6c0] ss:$8 sps:$4 sm:$0xff]  }
 0x142   :  { %3709 = vmatpush1.bf16.msra.mxu0 %v5181_v43  ;;  %3908 = vmatpush1.bf16.msra.mxu1 %v5184_v44  ;;  %v1064_v62 = vpop.f32.mrb[15].mxu1  ;;  %v732_v43 = vadd.f32 %v5917_v56, %v160_v34  ;;  %v5225_v44 = vld [vmem:[#allocation7 + $0x1f4] ss:$8 sps:$4 sm:$0xff]   ;;  %v5956_v56 = vsub.s32 7, %v5885_v21  ;;  %v5250_v34 = vld [vmem:[#allocation7 + $0x700] ss:$8 sps:$4 sm:$0xff]  }
 0x143   :  { %3710 = vmatprep.subr.bf16.mxu0 %v5189_v47  ;;  %3909 = vmatprep.subr.bf16.mxu1 %v5192_v48  ;;  %v5228_v47 = vld [vmem:[#allocation7 + $0x6c4] ss:$8 sps:$4 sm:$0xff]   ;;  %v775_v48 = vadd.f32 %v5921_v20, %v172_v38  ;;  %v5232_v62 = vld [vmem:[#allocation7 + $0x6d0] ss:$8 sps:$4 sm:$0xff]   ;;  %v5253_v38 = vld [vmem:[#allocation7 + $0x240] ss:$8 sps:$4 sm:$0xff]  }
 0x145   :  { %v1193_v58 = vmax.f32 %v775_v48, 0.0  ;;  %v5267_v48 = vld [vmem:[#allocation7 + $0x264] ss:$8 sps:$4 sm:$0xff]  }
 0x146   :  { %3711 = vmatpush1.bf16.msra.mxu0 %v5187_v51  ;;  %3910 = vmatpush1.bf16.msra.mxu1 %v5190_v52  ;;  %v1190_v51 = vmax.f32 %v732_v43, 0.0  ;;  %v5231_v52 = vld [vmem:[#allocation7 + $0x204] ss:$8 sps:$4 sm:$0xff]  }
 0x147   :  { %3712 = vmatprep.subr.bf16.mxu0 %v5195_v53  ;;  %3911 = vmatprep.subr.bf16.mxu1 %v5198_v54  ;;  %v5234_v53 = vld [vmem:[#allocation7 + $0x6d4] ss:$8 sps:$4 sm:$0xff]   ;;  %v5953_v54 = vsub.s32 4, %v5885_v21  ;;  %v5264_v43 = vld [vmem:[#allocation7 + $0x724] ss:$8 sps:$4 sm:$0xff]  }
 0x149   :  { %v5940_v5 = vpop.f32.mrb[16].mxu0  ;;  %v200_v20 = vrot.slane %v5903_v40, %v5953_v54 }
 0x14a   :  { %3713 = vmatpush1.bf16.msra.mxu0 %v5193_v59  ;;  %3912 = vmatpush1.bf16.msra.mxu1 %v5196_v60  ;;  %v938_v8 = vpop.f32.mrb[17].mxu0  ;;  %v5229_v59 = vld [vmem:[#allocation7 + $0x200] ss:$8 sps:$4 sm:$0xff]   ;;  %v1215_v60 = vpack.c.bf16 %v1190_v51, %v1190_v51  ;;  %v5268_v51 = vld [vmem:[#allocation7 + $0x730] ss:$8 sps:$4 sm:$0xff]  }
 0x14b   :  { %3714 = vmatprep.subr.bf16.mxu0 %v5201_v63  ;;  %3913 = vmatprep.subr.bf16.mxu1 %v5204_v1  ;;  %v939_v9 = vadd.f32 %v938_v8, %v204_v2  ;;  %v940_v10 = vpop.f32.mrb[18].mxu0  ;;  %v5942_v19 = vpop.f32.mrb[16].mxu1  ;;  %v5237_v63 = vld [vmem:[#allocation7 + $0x214] ss:$8 sps:$4 sm:$0xff]   ;;  %v1218_v1 = vpack.c.bf16 %v1193_v58, %v1193_v58  ;;  %v5240_v2 = vld [vmem:[#allocation7 + $0x6e4] ss:$8 sps:$4 sm:$0xff]  }
 0x14c   :  { %v941_v11 = vpop.f32.mrb[19].mxu0  ;;  %v5944_v26 = vpop.f32.mrb[17].mxu1  ;;  %v5238_v8 = vld [vmem:[#allocation7 + $0x6e0] ss:$8 sps:$4 sm:$0xff]   ;;  %v5271_v58 = vld [vmem:[#allocation7 + $0x270] ss:$8 sps:$4 sm:$0xff]  }
 0x14d   :  { %v1201_v14 = vmax.f32 %v939_v9, 0.0  ;;  %v1145_v27 = vpop.f32.mrb[18].mxu1  ;;  %v5243_v9 = vld [vmem:[#allocation7 + $0x224] ss:$8 sps:$4 sm:$0xff]   ;;  %v5246_v11 = vld [vmem:[#allocation7 + $0x6f4] ss:$8 sps:$4 sm:$0xff]  }
 0x14e   :  { %3715 = vmatpush1.bf16.msra.mxu0 %v5199_v3  ;;  %3914 = vmatpush1.bf16.msra.mxu1 %v5202_v4  ;;  %v1146_v32 = vpop.f32.mrb[19].mxu1  ;;  %v212_v3 = vrot.slane %v5903_v40, %v5956_v56  ;;  %v5252_v27 = vld [vmem:[#allocation7 + $0x704] ss:$8 sps:$4 sm:$0xff]  }
 0x14f   :  { %3716 = vmatprep.subr.bf16.mxu0 %v5207_v6  ;;  %3915 = vmatprep.subr.bf16.mxu1 %v5210_v7  ;;  %v1226_v25 = vpack.c.bf16 %v1201_v14, %v1201_v14  ;;  %v937_v6 = vadd.f32 %v5940_v5, %v200_v20  ;;  %v5235_v7 = vld [vmem:[#allocation7 + $0x210] ss:$8 sps:$4 sm:$0xff]   ;;  %v5279_v20 = vld [vmem:[#allocation7 + $0x284] ss:$8 sps:$4 sm:$0xff]  }
 0x150   :  { %v5244_v5 = vld [vmem:[#allocation7 + $0x6f0] ss:$8 sps:$4 sm:$0xff]  }
 0x151   :  { %3929 = vmatprep.mubr.bf16.mxu1 %v1226_v25  ;;  %v5249_v25 = vld [vmem:[#allocation7 + $0x234] ss:$8 sps:$4 sm:$0xff]   ;;  %v5247_v32 = vld [vmem:[#allocation7 + $0x230] ss:$8 sps:$4 sm:$0xff]  }
 0x152   :  { %3717 = vmatpush1.bf16.msra.mxu0 %v5205_v12  ;;  %3916 = vmatpush1.bf16.msra.mxu1 %v5208_v13  ;;  %v980_v12 = vadd.f32 %v5925_v36, %v212_v3  ;;  %v5258_v36 = vld [vmem:[#allocation7 + $0x714] ss:$8 sps:$4 sm:$0xff]   ;;  %v5283_v3 = vld [vmem:[#allocation7 + $0x290] ss:$8 sps:$4 sm:$0xff]  }
 0x153   :  { %3718 = vmatprep.subr.bf16.mxu0 %v5213_v16  ;;  %3917 = vmatprep.subr.bf16.mxu1 %v5216_v18  ;;  %v1200_v16 = vmax.f32 %v937_v6, 0.0  ;;  %v5241_v18 = vld [vmem:[#allocation7 + $0x220] ss:$8 sps:$4 sm:$0xff]  }
 0x154   :  { %v5286_v6 = vld [vmem:[#allocation7 + $0x760] ss:$8 sps:$4 sm:$0xff]  }
 0x155   :  { %v5962_v4 = vpop.f32.mrb[20].mxu0 }
 0x156   :  { %3719 = vmatpush1.bf16.msra.mxu0 %v5211_v29  ;;  %3918 = vmatpush1.bf16.msra.mxu1 %v5214_v30  ;;  %v5965_v10 = vpop.f32.mrb[21].mxu0  ;;  %v1203_v29 = vmax.f32 %v980_v12, 0.0  ;;  %v1225_v30 = vpack.c.bf16 %v1200_v16, %v1200_v16  ;;  %v5297_v12 = vld [vmem:[#allocation7 + $0x2b4] ss:$8 sps:$4 sm:$0xff]   ;;  %v5298_v16 = vld [vmem:[#allocation7 + $0x780] ss:$8 sps:$4 sm:$0xff]  }
 0x157   :  { %3720 = vmatprep.subr.bf16.mxu0 %v5219_v35  ;;  %3919 = vmatprep.subr.bf16.mxu1 %v5222_v37  ;;  %v1022_v13 = vpop.f32.mrb[22].mxu0  ;;  %v5255_v35 = vld [vmem:[#allocation7 + $0x244] ss:$8 sps:$4 sm:$0xff]  }
 0x158   :  { %v1023_v14 = vpop.f32.mrb[23].mxu0  ;;  %v1228_v37 = vpack.c.bf16 %v1203_v29, %v1203_v29  ;;  %v5300_v13 = vld [vmem:[#allocation7 + $0x784] ss:$8 sps:$4 sm:$0xff]   ;;  %v5309_v29 = vld [vmem:[#allocation7 + $0x2d4] ss:$8 sps:$4 sm:$0xff]  }
 0x159   :  { %v5295_v14 = vld [vmem:[#allocation7 + $0x2b0] ss:$8 sps:$4 sm:$0xff]  }
 0x15a   :  { %3721 = vmatpush1.bf16.msra.mxu0 %v5217_v39  ;;  %3920 = vmatpush1.bf16.msra.mxu1 %v5220_v41  ;;  %v5256_v39 = vld [vmem:[#allocation7 + $0x710] ss:$8 sps:$4 sm:$0xff]   ;;  %v5261_v41 = vld [vmem:[#allocation7 + $0x254] ss:$8 sps:$4 sm:$0xff]  }
 0x15b   :  { %3722 = vmatprep.subr.bf16.mxu0 %v5225_v44  ;;  %3921 = vmatprep.subr.bf16.mxu1 %v5228_v47  ;;  %v5259_v44 = vld [vmem:[#allocation7 + $0x250] ss:$8 sps:$4 sm:$0xff]   ;;  %v5262_v47 = vld [vmem:[#allocation7 + $0x720] ss:$8 sps:$4 sm:$0xff]  }
 0x15e   :  { %3723 = vmatpush1.bf16.msra.mxu0 %v5223_v15  ;;  %3922 = vmatpush1.bf16.msra.mxu1 %v5226_v50  ;;  %v5270_v15 = vld [vmem:[#allocation7 + $0x734] ss:$8 sps:$4 sm:$0xff]   ;;  %v5265_v50 = vld [vmem:[#allocation7 + $0x260] ss:$8 sps:$4 sm:$0xff]  }
 0x15f   :  { %3733 = vmatprep.subr.bf16.mxu0 %v5231_v52  ;;  %3923 = vmatprep.subr.bf16.mxu1 %v5234_v53  ;;  %v5273_v52 = vld [vmem:[#allocation7 + $0x274] ss:$8 sps:$4 sm:$0xff]   ;;  %v5276_v53 = vld [vmem:[#allocation7 + $0x744] ss:$8 sps:$4 sm:$0xff]  }
 0x161   :  { %3725 = vmatmul.mubr.bf16.vlgmr.msra.gmra.mrb[32].mxu0 %v1215_v60  ;;  %v5282_v60 = vld [vmem:[#allocation7 + $0x754] ss:$8 sps:$4 sm:$0xff]  }
 0x162   :  { %3734 = vmatpush1.bf16.msra.mxu0 %v5229_v59  ;;  %3765 = vmatprep.mubr.bf16.mxu0 %v1218_v1  ;;  %v5274_v59 = vld [vmem:[#allocation7 + $0x740] ss:$8 sps:$4 sm:$0xff]   ;;  %v5285_v1 = vld [vmem:[#allocation7 + $0x294] ss:$8 sps:$4 sm:$0xff]  }
 0x163   :  { %3924 = vmatpush1.bf16.msra.mxu1 %v5232_v62  ;;  %3735 = vmatprep.subr.bf16.mxu0 %v5237_v63  ;;  %v5277_v62 = vld [vmem:[#allocation7 + $0x280] ss:$8 sps:$4 sm:$0xff]   ;;  %v5280_v63 = vld [vmem:[#allocation7 + $0x750] ss:$8 sps:$4 sm:$0xff]  }
 0x164   :  { %3925 = vmatprep.subr.bf16.mxu1 %v5240_v2  ;;  %v5288_v2 = vld [vmem:[#allocation7 + $0x764] ss:$8 sps:$4 sm:$0xff]  }
 0x166   :  { %3736 = vmatpush1.bf16.msra.mxu0 %v5235_v7  ;;  %v5291_v7 = vld [vmem:[#allocation7 + $0x2a4] ss:$8 sps:$4 sm:$0xff]  }
 0x167   :  { %3926 = vmatpush1.bf16.msra.mxu1 %v5238_v8  ;;  %3737 = vmatprep.subr.bf16.mxu0 %v5243_v9  ;;  %v5294_v8 = vld [vmem:[#allocation7 + $0x774] ss:$8 sps:$4 sm:$0xff]   ;;  %v5289_v9 = vld [vmem:[#allocation7 + $0x2a0] ss:$8 sps:$4 sm:$0xff]  }
 0x168   :  { %3927 = vmatprep.subr.bf16.mxu1 %v5246_v11  ;;  %v5292_v11 = vld [vmem:[#allocation7 + $0x770] ss:$8 sps:$4 sm:$0xff]  }
 0x16a   :  { %3738 = vmatpush1.bf16.msra.mxu0 %v5241_v18  ;;  %v5303_v18 = vld [vmem:[#allocation7 + $0x2c4] ss:$8 sps:$4 sm:$0xff]  }
 0x16b   :  { %3928 = vmatpush1.bf16.msra.mxu1 %v5244_v5  ;;  %3739 = vmatprep.subr.bf16.mxu0 %v5249_v25  ;;  %v5306_v5 = vld [vmem:[#allocation7 + $0x794] ss:$8 sps:$4 sm:$0xff]   ;;  %v5301_v25 = vld [vmem:[#allocation7 + $0x2c0] ss:$8 sps:$4 sm:$0xff]  }
 0x16c   :  { %3938 = vmatprep.subr.bf16.mxu1 %v5252_v27  ;;  %v5304_v27 = vld [vmem:[#allocation7 + $0x790] ss:$8 sps:$4 sm:$0xff]  }
 0x16e   :  { %3930 = vmatmul.mubr.bf16.vlgmr.msra.gmra.mrb[20].mxu1 %v1225_v30  ;;  %3740 = vmatpush1.bf16.msra.mxu0 %v5247_v32  ;;  %v5312_v30 = vld [vmem:[#allocation7 + $0x7a4] ss:$8 sps:$4 sm:$0xff]   ;;  %v5307_v32 = vld [vmem:[#allocation7 + $0x2d0] ss:$8 sps:$4 sm:$0xff]  }
 0x16f   :  { %3939 = vmatpush1.bf16.msra.mxu1 %v5250_v34  ;;  %3741 = vmatprep.subr.bf16.mxu0 %v5255_v35  ;;  %v168_v34 = vrot.slane %v5887_v22, %v5953_v54  ;;  %v5310_v35 = vld [vmem:[#allocation7 + $0x7a0] ss:$8 sps:$4 sm:$0xff]  }
 0x170   :  { %3940 = vmatprep.subr.bf16.mxu1 %v5258_v36  ;;  %3970 = vmatprep.mubr.bf16.mxu1 %v1228_v37  ;;  %v5315_v36 = vld [vmem:[#allocation7 + $0x2e4] ss:$8 sps:$4 sm:$0xff]   ;;  %v5970_v37 = vpop.f32.mrb[24].mxu0 }
 0x172   :  { %3742 = vmatpush1.bf16.msra.mxu0 %v5253_v38  ;;  %v180_v38 = vrot.slane %v5887_v22, %v5956_v56  ;;  %v5319_v22 = vld [vmem:[#allocation7 + $0x2f0] ss:$8 sps:$4 sm:$0xff]  }
 0x173   :  { %3941 = vmatpush1.bf16.msra.mxu1 %v5256_v39  ;;  %3743 = vmatprep.subr.bf16.mxu0 %v5261_v41  ;;  %v5318_v39 = vld [vmem:[#allocation7 + $0x7b4] ss:$8 sps:$4 sm:$0xff]   ;;  %v5974_v41 = vpop.f32.mrb[25].mxu0 }
 0x174   :  { %3942 = vmatprep.subr.bf16.mxu1 %v5264_v43  ;;  %v1104_v43 = vpop.f32.mrb[26].mxu0 }
 0x175   :  { %v5349_v43 = vld [vmem:[#allocation7 + $0x340] ss:$8 sps:$4 sm:$0xff]  }
 0x176   :  { %3744 = vmatpush1.bf16.msra.mxu0 %v5259_v44  ;;  %v5313_v44 = vld [vmem:[#allocation7 + $0x2e0] ss:$8 sps:$4 sm:$0xff]  }
 0x177   :  { %3943 = vmatpush1.bf16.msra.mxu1 %v5262_v47  ;;  %3745 = vmatprep.subr.bf16.mxu0 %v5267_v48  ;;  %v1105_v47 = vpop.f32.mrb[27].mxu0  ;;  %v773_v48 = vadd.f32 %v5919_v17, %v168_v34  ;;  %v5330_v17 = vld [vmem:[#allocation7 + $0x7d4] ss:$8 sps:$4 sm:$0xff]  }
 0x178   :  { %3944 = vmatprep.subr.bf16.mxu1 %v5270_v15  ;;  %v5316_v15 = vld [vmem:[#allocation7 + $0x7b0] ss:$8 sps:$4 sm:$0xff]   ;;  %v5357_v47 = vld [vmem:[#allocation7 + $0x354] ss:$8 sps:$4 sm:$0xff]  }
 0x17a   :  { %3746 = vmatpush1.bf16.msra.mxu0 %v5265_v50  ;;  %v5321_v50 = vld [vmem:[#allocation7 + $0x2f4] ss:$8 sps:$4 sm:$0xff]  }
 0x17b   :  { %3945 = vmatpush1.bf16.msra.mxu1 %v5268_v51  ;;  %3747 = vmatprep.subr.bf16.mxu0 %v5273_v52  ;;  %v816_v51 = vadd.f32 %v5901_v31, %v180_v38  ;;  %v5324_v52 = vld [vmem:[#allocation7 + $0x7c4] ss:$8 sps:$4 sm:$0xff]  }
 0x17c   :  { %3946 = vmatprep.subr.bf16.mxu1 %v5276_v53  ;;  %v1192_v53 = vmax.f32 %v773_v48, 0.0  ;;  %v5351_v38 = vld [vmem:[#allocation7 + $0x344] ss:$8 sps:$4 sm:$0xff]  }
 0x17d   :  { %v5360_v48 = vld [vmem:[#allocation7 + $0x824] ss:$8 sps:$4 sm:$0xff]  }
 0x17e   :  { %3748 = vmatpush1.bf16.msra.mxu0 %v5271_v58  ;;  %v5322_v58 = vld [vmem:[#allocation7 + $0x7c0] ss:$8 sps:$4 sm:$0xff]  }
 0x17f   :  { %3947 = vmatpush1.bf16.msra.mxu1 %v5274_v59  ;;  %3749 = vmatprep.subr.bf16.mxu0 %v5279_v20  ;;  %v5327_v59 = vld [vmem:[#allocation7 + $0x304] ss:$8 sps:$4 sm:$0xff]   ;;  %v5979_v20 = vsub.s32 6, %v5885_v21 }
 0x180   :  { %3948 = vmatprep.subr.bf16.mxu1 %v5282_v60  ;;  %v1195_v60 = vmax.f32 %v816_v51, 0.0  ;;  %v5336_v21 = vld [vmem:[#allocation7 + $0x7e4] ss:$8 sps:$4 sm:$0xff]  }
 0x181   :  { %v208_v31 = vrot.slane %v5903_v40, %v5979_v20  ;;  %v5331_v40 = vld [vmem:[#allocation7 + $0x310] ss:$8 sps:$4 sm:$0xff]   ;;  %v5363_v51 = vld [vmem:[#allocation7 + $0x364] ss:$8 sps:$4 sm:$0xff]  }
 0x182   :  { %3750 = vmatpush1.bf16.msra.mxu0 %v5277_v62  ;;  %v5325_v62 = vld [vmem:[#allocation7 + $0x300] ss:$8 sps:$4 sm:$0xff]  }
 0x183   :  { %3949 = vmatpush1.bf16.msra.mxu1 %v5280_v63  ;;  %3751 = vmatprep.subr.bf16.mxu0 %v5285_v1  ;;  %v5328_v63 = vld [vmem:[#allocation7 + $0x7d0] ss:$8 sps:$4 sm:$0xff]   ;;  %v1217_v1 = vpack.c.bf16 %v1192_v53, %v1192_v53 }
 0x184   :  { %3950 = vmatprep.subr.bf16.mxu1 %v5288_v2  ;;  %v5333_v2 = vld [vmem:[#allocation7 + $0x314] ss:$8 sps:$4 sm:$0xff]   ;;  %v5364_v53 = vld [vmem:[#allocation7 + $0x830] ss:$8 sps:$4 sm:$0xff]  }
 0x186   :  { %3752 = vmatpush1.bf16.msra.mxu0 %v5283_v3  ;;  %v5983_v3 = vld [vmem:[#allocation2 + $0x40] ss:$4 sm:$0xff] }
 0x187   :  { %3951 = vmatpush1.bf16.msra.mxu1 %v5286_v6  ;;  %3753 = vmatprep.subr.bf16.mxu0 %v5291_v7  ;;  %v5985_v6 = vpop.f32.mrb[28].mxu0  ;;  %v1220_v7 = vpack.c.bf16 %v1195_v60, %v1195_v60  ;;  %v5367_v60 = vld [vmem:[#allocation7 + $0x370] ss:$8 sps:$4 sm:$0xff]  }
 0x188   :  { %3952 = vmatprep.subr.bf16.mxu1 %v5294_v8  ;;  %v220_v8 = vrot.slane %v5983_v3, %v5893_v24 }
 0x18a   :  { %3754 = vmatpush1.bf16.msra.mxu0 %v5289_v9  ;;  %v4876_v9 = vpop.f32.mrb[29].mxu0 }
 0x18b   :  { %3953 = vmatpush1.bf16.msra.mxu1 %v5292_v11  ;;  %3755 = vmatprep.subr.bf16.mxu0 %v5297_v12  ;;  %v1185_v11 = vpop.f32.mrb[30].mxu0  ;;  %v978_v12 = vadd.f32 %v5923_v33, %v208_v31  ;;  %v5348_v33 = vld [vmem:[#allocation7 + $0x804] ss:$8 sps:$4 sm:$0xff]   ;;  %v5373_v31 = vld [vmem:[#allocation7 + $0x380] ss:$8 sps:$4 sm:$0xff]  }
 0x18c   :  { %3954 = vmatprep.subr.bf16.mxu1 %v5300_v13  ;;  %v4877_v13 = vpop.f32.mrb[31].mxu0  ;;  %v5387_v9 = vld [vmem:[#allocation7 + $0x3a4] ss:$8 sps:$4 sm:$0xff]   ;;  %v5390_v11 = vld [vmem:[#allocation7 + $0x874] ss:$8 sps:$4 sm:$0xff]  }
 0x18d   :  { %v5393_v13 = vld [vmem:[#allocation7 + $0x3b4] ss:$8 sps:$4 sm:$0xff]  }
 0x18e   :  { %3756 = vmatpush1.bf16.msra.mxu0 %v5295_v14  ;;  %v5334_v14 = vld [vmem:[#allocation7 + $0x7e0] ss:$8 sps:$4 sm:$0xff]  }
 0x18f   :  { %3955 = vmatpush1.bf16.msra.mxu1 %v5298_v16  ;;  %3757 = vmatprep.subr.bf16.mxu0 %v5303_v18  ;;  %v5339_v16 = vld [vmem:[#allocation7 + $0x324] ss:$8 sps:$4 sm:$0xff]   ;;  %v5342_v18 = vld [vmem:[#allocation7 + $0x7f4] ss:$8 sps:$4 sm:$0xff]  }
 0x190   :  { %3956 = vmatprep.subr.bf16.mxu1 %v5306_v5  ;;  %v1021_v5 = vadd.f32 %v5965_v10, %v220_v8  ;;  %v5382_v8 = vld [vmem:[#allocation7 + $0x860] ss:$8 sps:$4 sm:$0xff]  }
 0x192   :  { %3758 = vmatpush1.bf16.msra.mxu0 %v5301_v25  ;;  %v1202_v25 = vmax.f32 %v978_v12, 0.0  ;;  %v5385_v12 = vld [vmem:[#allocation7 + $0x3a0] ss:$8 sps:$4 sm:$0xff]  }
 0x193   :  { %3957 = vmatpush1.bf16.msra.mxu1 %v5304_v27  ;;  %3759 = vmatprep.subr.bf16.mxu0 %v5309_v29  ;;  %v5337_v27 = vld [vmem:[#allocation7 + $0x320] ss:$8 sps:$4 sm:$0xff]   ;;  %v5340_v29 = vld [vmem:[#allocation7 + $0x7f0] ss:$8 sps:$4 sm:$0xff]  }
 0x194   :  { %3958 = vmatprep.subr.bf16.mxu1 %v5312_v30  ;;  %v5345_v30 = vld [vmem:[#allocation7 + $0x334] ss:$8 sps:$4 sm:$0xff]   ;;  %v1227_v34 = vpack.c.bf16 %v1202_v25, %v1202_v25 }
 0x195   :  { %v5402_v25 = vld [vmem:[#allocation7 + $0x894] ss:$8 sps:$4 sm:$0xff]  }
 0x196   :  { %3760 = vmatpush1.bf16.msra.mxu0 %v5307_v32  ;;  %v1205_v32 = vmax.f32 %v1021_v5, 0.0  ;;  %v5399_v5 = vld [vmem:[#allocation7 + $0x3c4] ss:$8 sps:$4 sm:$0xff]  }
 0x197   :  { %3959 = vmatpush1.bf16.msra.mxu1 %v5310_v35  ;;  %3761 = vmatprep.subr.bf16.mxu0 %v5315_v36  ;;  %v5343_v35 = vld [vmem:[#allocation7 + $0x330] ss:$8 sps:$4 sm:$0xff]   ;;  %v5346_v36 = vld [vmem:[#allocation7 + $0x800] ss:$8 sps:$4 sm:$0xff]  }
 0x198   :  { %3960 = vmatprep.subr.bf16.mxu1 %v5318_v39  ;;  %v5354_v39 = vld [vmem:[#allocation7 + $0x814] ss:$8 sps:$4 sm:$0xff]   ;;  %v1230_v10 = vpack.c.bf16 %v1205_v32, %v1205_v32  ;;  %v5403_v32 = vld [vmem:[#allocation7 + $0x3d0] ss:$8 sps:$4 sm:$0xff]  }
 0x19a   :  { %3762 = vmatpush1.bf16.msra.mxu0 %v5313_v44  ;;  %v5352_v44 = vld [vmem:[#allocation7 + $0x810] ss:$8 sps:$4 sm:$0xff]  }
 0x19b   :  { %3961 = vmatpush1.bf16.msra.mxu1 %v5316_v15  ;;  %3763 = vmatprep.subr.bf16.mxu0 %v5321_v50  ;;  %v5355_v15 = vld [vmem:[#allocation7 + $0x350] ss:$8 sps:$4 sm:$0xff]   ;;  %v5358_v50 = vld [vmem:[#allocation7 + $0x820] ss:$8 sps:$4 sm:$0xff]  }
 0x19c   :  { %3962 = vmatprep.subr.bf16.mxu1 %v5324_v52  ;;  %v5366_v52 = vld [vmem:[#allocation7 + $0x834] ss:$8 sps:$4 sm:$0xff]  }
 0x19e   :  { %3764 = vmatpush1.bf16.msra.mxu0 %v5319_v22  ;;  %v5361_v22 = vld [vmem:[#allocation7 + $0x360] ss:$8 sps:$4 sm:$0xff]  }
 0x19f   :  { %3963 = vmatpush1.bf16.msra.mxu1 %v5322_v58  ;;  %3774 = vmatprep.subr.bf16.mxu0 %v5327_v59  ;;  %v5369_v58 = vld [vmem:[#allocation7 + $0x374] ss:$8 sps:$4 sm:$0xff]   ;;  %v5372_v59 = vld [vmem:[#allocation7 + $0x844] ss:$8 sps:$4 sm:$0xff]  }
 0x1a0   :  { %3964 = vmatprep.subr.bf16.mxu1 %v5330_v17  ;;  %v5370_v17 = vld [vmem:[#allocation7 + $0x840] ss:$8 sps:$4 sm:$0xff]  }
 0x1a1   :  { %3766 = vmatmul.mubr.bf16.vlgmr.msra.gmra.mrb[32].mxu0 %v1217_v1  ;;  %v5376_v1 = vld [vmem:[#allocation7 + $0x850] ss:$8 sps:$4 sm:$0xff]  }
 0x1a2   :  { %3775 = vmatpush1.bf16.msra.mxu0 %v5325_v62  ;;  %3806 = vmatprep.mubr.bf16.mxu0 %v1220_v7  ;;  %v5375_v62 = vld [vmem:[#allocation7 + $0x384] ss:$8 sps:$4 sm:$0xff]  }
 0x1a3   :  { %3965 = vmatpush1.bf16.msra.mxu1 %v5328_v63  ;;  %3776 = vmatprep.subr.bf16.mxu0 %v5333_v2  ;;  %v5378_v63 = vld [vmem:[#allocation7 + $0x854] ss:$8 sps:$4 sm:$0xff]   ;;  %v5384_v7 = vld [vmem:[#allocation7 + $0x864] ss:$8 sps:$4 sm:$0xff]  }
 0x1a4   :  { %3966 = vmatprep.subr.bf16.mxu1 %v5336_v21  ;;  %v5381_v2 = vld [vmem:[#allocation7 + $0x394] ss:$8 sps:$4 sm:$0xff]   ;;  %v5379_v21 = vld [vmem:[#allocation7 + $0x390] ss:$8 sps:$4 sm:$0xff]  }
 0x1a6   :  { %3777 = vmatpush1.bf16.msra.mxu0 %v5331_v40  ;;  %v5388_v40 = vld [vmem:[#allocation7 + $0x870] ss:$8 sps:$4 sm:$0xff]  }
 0x1a7   :  { %3967 = vmatpush1.bf16.msra.mxu1 %v5334_v14  ;;  %3778 = vmatprep.subr.bf16.mxu0 %v5339_v16  ;;  %v5396_v14 = vld [vmem:[#allocation7 + $0x884] ss:$8 sps:$4 sm:$0xff]   ;;  %v5391_v16 = vld [vmem:[#allocation7 + $0x3b0] ss:$8 sps:$4 sm:$0xff]  }
 0x1a8   :  { %3968 = vmatprep.subr.bf16.mxu1 %v5342_v18  ;;  %v5394_v18 = vld [vmem:[#allocation7 + $0x880] ss:$8 sps:$4 sm:$0xff]  }
 0x1aa   :  { %3779 = vmatpush1.bf16.msra.mxu0 %v5337_v27  ;;  %v5397_v27 = vld [vmem:[#allocation7 + $0x3c0] ss:$8 sps:$4 sm:$0xff]  }
 0x1ab   :  { %3969 = vmatpush1.bf16.msra.mxu1 %v5340_v29  ;;  %3780 = vmatprep.subr.bf16.mxu0 %v5345_v30  ;;  %v5400_v29 = vld [vmem:[#allocation7 + $0x890] ss:$8 sps:$4 sm:$0xff]   ;;  %v5405_v30 = vld [vmem:[#allocation7 + $0x3d4] ss:$8 sps:$4 sm:$0xff]  }
 0x1ac   :  { %3979 = vmatprep.subr.bf16.mxu1 %v5348_v33  ;;  %v5408_v33 = vld [vmem:[#allocation7 + $0x8a4] ss:$8 sps:$4 sm:$0xff]  }
 0x1ae   :  { %3971 = vmatmul.mubr.bf16.vlgmr.msra.gmra.mrb[20].mxu1 %v1227_v34  ;;  %3781 = vmatpush1.bf16.msra.mxu0 %v5343_v35  ;;  %v5674_v34 = vld [vmem:[#allocation2] ss:$4 sm:$0xff] }
 0x1af   :  { %3980 = vmatpush1.bf16.msra.mxu1 %v5346_v36  ;;  %3782 = vmatprep.subr.bf16.mxu0 %v5351_v38  ;;  %v176_v35 = vrot.slane %v5674_v34, %v5979_v20  ;;  %v5406_v36 = vld [vmem:[#allocation7 + $0x8a0] ss:$8 sps:$4 sm:$0xff]   ;;  %v5411_v38 = vld [vmem:[#allocation7 + $0x3e4] ss:$8 sps:$4 sm:$0xff]  }
 0x1b0   :  { %3981 = vmatprep.subr.bf16.mxu1 %v5354_v39  ;;  %4011 = vmatprep.mubr.bf16.mxu1 %v1230_v10  ;;  %v5992_v39 = vld [vmem:[#allocation2 + $0x20] ss:$4 sm:$0xff] }
 0x1b1   :  { %v188_v10 = vrot.slane %v5992_v39, %v5893_v24  ;;  %v5456_v34 = vld [vmem:[#allocation7 + $0x924] ss:$8 sps:$4 sm:$0xff]  }
 0x1b2   :  { %3783 = vmatpush1.bf16.msra.mxu0 %v5349_v43  ;;  %v5414_v43 = vld [vmem:[#allocation7 + $0x8b4] ss:$8 sps:$4 sm:$0xff]  }
 0x1b3   :  { %3982 = vmatpush1.bf16.msra.mxu1 %v5352_v44  ;;  %3784 = vmatprep.subr.bf16.mxu0 %v5357_v47  ;;  %v5409_v44 = vld [vmem:[#allocation7 + $0x3e0] ss:$8 sps:$4 sm:$0xff]   ;;  %v814_v47 = vadd.f32 %v5899_v28, %v176_v35  ;;  %v5451_v35 = vld [vmem:[#allocation7 + $0x450] ss:$8 sps:$4 sm:$0xff]  }
 0x1b4   :  { %3983 = vmatprep.subr.bf16.mxu1 %v5360_v48  ;;  %v5412_v48 = vld [vmem:[#allocation7 + $0x8b0] ss:$8 sps:$4 sm:$0xff]   ;;  %v5421_v28 = vld [vmem:[#allocation7 + $0x400] ss:$8 sps:$4 sm:$0xff]  }
 0x1b6   :  { %3785 = vmatpush1.bf16.msra.mxu0 %v5355_v15  ;;  %v5417_v15 = vld [vmem:[#allocation7 + $0x3f4] ss:$8 sps:$4 sm:$0xff]  }
 0x1b7   :  { %3984 = vmatpush1.bf16.msra.mxu1 %v5358_v50  ;;  %3786 = vmatprep.subr.bf16.mxu0 %v5363_v51  ;;  %v857_v50 = vadd.f32 %v5929_v49, %v188_v10  ;;  %v5420_v51 = vld [vmem:[#allocation7 + $0x8c4] ss:$8 sps:$4 sm:$0xff]   ;;  %v5424_v49 = vld [vmem:[#allocation7 + $0x8d0] ss:$8 sps:$4 sm:$0xff]   ;;  %v5462_v10 = vld [vmem:[#allocation7 + $0x934] ss:$8 sps:$4 sm:$0xff]  }
 0x1b8   :  { %3985 = vmatprep.subr.bf16.mxu1 %v5366_v52  ;;  %v5415_v52 = vld [vmem:[#allocation7 + $0x3f0] ss:$8 sps:$4 sm:$0xff]  }
 0x1ba   :  { %3787 = vmatpush1.bf16.msra.mxu0 %v5361_v22  ;;  %v1194_v22 = vmax.f32 %v814_v47, 0.0  ;;  %v5465_v47 = vld [vmem:[#allocation7 + $0x474] ss:$8 sps:$4 sm:$0xff]  }
 0x1bb   :  { %3986 = vmatpush1.bf16.msra.mxu1 %v5364_v53  ;;  %3788 = vmatprep.subr.bf16.mxu0 %v5369_v58  ;;  %v5418_v53 = vld [vmem:[#allocation7 + $0x8c0] ss:$8 sps:$4 sm:$0xff]   ;;  %v5423_v58 = vld [vmem:[#allocation7 + $0x404] ss:$8 sps:$4 sm:$0xff]  }
 0x1bc   :  { %3987 = vmatprep.subr.bf16.mxu1 %v5372_v59  ;;  %v1197_v59 = vmax.f32 %v857_v50, 0.0  ;;  %v5466_v50 = vld [vmem:[#allocation7 + $0x940] ss:$8 sps:$4 sm:$0xff]  }
 0x1be   :  { %3789 = vmatpush1.bf16.msra.mxu0 %v5367_v60  ;;  %v5426_v60 = vld [vmem:[#allocation7 + $0x8d4] ss:$8 sps:$4 sm:$0xff]  }
 0x1bf   :  { %3988 = vmatpush1.bf16.msra.mxu1 %v5370_v17  ;;  %3790 = vmatprep.subr.bf16.mxu0 %v5375_v62  ;;  %v216_v17 = vrot.slane %v5983_v3, %v5890_v23  ;;  %v1219_v62 = vpack.c.bf16 %v1194_v22, %v1194_v22  ;;  %v5469_v22 = vld [vmem:[#allocation7 + $0x480] ss:$8 sps:$4 sm:$0xff]  }
 0x1c0   :  { %3989 = vmatprep.subr.bf16.mxu1 %v5378_v63  ;;  %v5429_v63 = vld [vmem:[#allocation7 + $0x414] ss:$8 sps:$4 sm:$0xff]  }
 0x1c2   :  { %3791 = vmatpush1.bf16.msra.mxu0 %v5373_v31  ;;  %v1222_v31 = vpack.c.bf16 %v1197_v59, %v1197_v59  ;;  %v5480_v59 = vld [vmem:[#allocation7 + $0x964] ss:$8 sps:$4 sm:$0xff]  }
 0x1c3   :  { %3990 = vmatpush1.bf16.msra.mxu1 %v5376_v1  ;;  %3792 = vmatprep.subr.bf16.mxu0 %v5381_v2  ;;  %v5432_v1 = vld [vmem:[#allocation7 + $0x8e4] ss:$8 sps:$4 sm:$0xff]   ;;  %v228_v2 = vrot.slane %v5983_v3, %v5909_v45  ;;  %v5436_v45 = vld [vmem:[#allocation7 + $0x8f0] ss:$8 sps:$4 sm:$0xff]  }
 0x1c4   :  { %3991 = vmatprep.subr.bf16.mxu1 %v5384_v7  ;;  %v1019_v7 = vadd.f32 %v5962_v4, %v216_v17  ;;  %v5444_v4 = vld [vmem:[#allocation7 + $0x904] ss:$8 sps:$4 sm:$0xff]  }
 0x1c5   :  { %v5483_v17 = vld [vmem:[#allocation7 + $0x4a4] ss:$8 sps:$4 sm:$0xff]  }
 0x1c6   :  { %3793 = vmatpush1.bf16.msra.mxu0 %v5379_v21  ;;  %v5427_v21 = vld [vmem:[#allocation7 + $0x410] ss:$8 sps:$4 sm:$0xff]  }
 0x1c7   :  { %3992 = vmatpush1.bf16.msra.mxu1 %v5382_v8  ;;  %3794 = vmatprep.subr.bf16.mxu0 %v5387_v9  ;;  %v5430_v8 = vld [vmem:[#allocation7 + $0x8e0] ss:$8 sps:$4 sm:$0xff]   ;;  %v5435_v9 = vld [vmem:[#allocation7 + $0x424] ss:$8 sps:$4 sm:$0xff]  }
 0x1c8   :  { %3993 = vmatprep.subr.bf16.mxu1 %v5390_v11  ;;  %v5438_v11 = vld [vmem:[#allocation7 + $0x8f4] ss:$8 sps:$4 sm:$0xff]  }
 0x1ca   :  { %3795 = vmatpush1.bf16.msra.mxu0 %v5385_v12  ;;  %v1062_v12 = vadd.f32 %v5933_v57, %v228_v2  ;;  %v5487_v2 = vld [vmem:[#allocation7 + $0x4b0] ss:$8 sps:$4 sm:$0xff]  }
 0x1cb   :  { %3994 = vmatpush1.bf16.msra.mxu1 %v5388_v40  ;;  %3796 = vmatprep.subr.bf16.mxu0 %v5393_v13  ;;  %v1204_v40 = vmax.f32 %v1019_v7, 0.0  ;;  %v5433_v13 = vld [vmem:[#allocation7 + $0x420] ss:$8 sps:$4 sm:$0xff]  }
 0x1cc   :  { %3995 = vmatprep.subr.bf16.mxu1 %v5396_v14  ;;  %v5441_v14 = vld [vmem:[#allocation7 + $0x434] ss:$8 sps:$4 sm:$0xff]   ;;  %v5490_v7 = vld [vmem:[#allocation7 + $0x980] ss:$8 sps:$4 sm:$0xff]  }
 0x1ce   :  { %3797 = vmatpush1.bf16.msra.mxu0 %v5391_v16  ;;  %v1207_v16 = vmax.f32 %v1062_v12, 0.0  ;;  %v5501_v12 = vld [vmem:[#allocation7 + $0x4d4] ss:$8 sps:$4 sm:$0xff]  }
 0x1cf   :  { %3996 = vmatpush1.bf16.msra.mxu1 %v5394_v18  ;;  %3798 = vmatprep.subr.bf16.mxu0 %v5399_v5  ;;  %v1229_v18 = vpack.c.bf16 %v1204_v40, %v1204_v40  ;;  %v5439_v5 = vld [vmem:[#allocation7 + $0x430] ss:$8 sps:$4 sm:$0xff]   ;;  %v5504_v40 = vld [vmem:[#allocation7 + $0x9a4] ss:$8 sps:$4 sm:$0xff]  }
 0x1d0   :  { %3997 = vmatprep.subr.bf16.mxu1 %v5402_v25  ;;  %v5442_v25 = vld [vmem:[#allocation7 + $0x900] ss:$8 sps:$4 sm:$0xff]   ;;  %v1232_v57 = vpack.c.bf16 %v1207_v16, %v1207_v16  ;;  %v5510_v16 = vld [vmem:[#allocation7 + $0x9b4] ss:$8 sps:$4 sm:$0xff]  }
 0x1d2   :  { %3799 = vmatpush1.bf16.msra.mxu0 %v5397_v27  ;;  %v5447_v27 = vld [vmem:[#allocation7 + $0x444] ss:$8 sps:$4 sm:$0xff]  }
 0x1d3   :  { %3998 = vmatpush1.bf16.msra.mxu1 %v5400_v29  ;;  %3800 = vmatprep.subr.bf16.mxu0 %v5405_v30  ;;  %v5450_v29 = vld [vmem:[#allocation7 + $0x914] ss:$8 sps:$4 sm:$0xff]   ;;  %v5445_v30 = vld [vmem:[#allocation7 + $0x440] ss:$8 sps:$4 sm:$0xff]  }
 0x1d4   :  { %3999 = vmatprep.subr.bf16.mxu1 %v5408_v33  ;;  %v5448_v33 = vld [vmem:[#allocation7 + $0x910] ss:$8 sps:$4 sm:$0xff]  }
 0x1d6   :  { %3801 = vmatpush1.bf16.msra.mxu0 %v5403_v32  ;;  %v5453_v32 = vld [vmem:[#allocation7 + $0x454] ss:$8 sps:$4 sm:$0xff]  }
 0x1d7   :  { %4000 = vmatpush1.bf16.msra.mxu1 %v5406_v36  ;;  %3802 = vmatprep.subr.bf16.mxu0 %v5411_v38  ;;  %v5454_v36 = vld [vmem:[#allocation7 + $0x920] ss:$8 sps:$4 sm:$0xff]   ;;  %v5459_v38 = vld [vmem:[#allocation7 + $0x464] ss:$8 sps:$4 sm:$0xff]  }
 0x1d8   :  { %4001 = vmatprep.subr.bf16.mxu1 %v5414_v43  ;;  %v5457_v43 = vld [vmem:[#allocation7 + $0x460] ss:$8 sps:$4 sm:$0xff]  }
 0x1da   :  { %3803 = vmatpush1.bf16.msra.mxu0 %v5409_v44  ;;  %v5460_v44 = vld [vmem:[#allocation7 + $0x930] ss:$8 sps:$4 sm:$0xff]  }
 0x1db   :  { %4002 = vmatpush1.bf16.msra.mxu1 %v5412_v48  ;;  %3804 = vmatprep.subr.bf16.mxu0 %v5417_v15  ;;  %v5468_v48 = vld [vmem:[#allocation7 + $0x944] ss:$8 sps:$4 sm:$0xff]   ;;  %v5463_v15 = vld [vmem:[#allocation7 + $0x470] ss:$8 sps:$4 sm:$0xff]  }
 0x1dc   :  { %4003 = vmatprep.subr.bf16.mxu1 %v5420_v51  ;;  %v5471_v51 = vld [vmem:[#allocation7 + $0x484] ss:$8 sps:$4 sm:$0xff]  }
 0x1de   :  { %3805 = vmatpush1.bf16.msra.mxu0 %v5415_v52  ;;  %v5474_v52 = vld [vmem:[#allocation7 + $0x954] ss:$8 sps:$4 sm:$0xff]  }
 0x1df   :  { %4004 = vmatpush1.bf16.msra.mxu1 %v5418_v53  ;;  %3815 = vmatprep.subr.bf16.mxu0 %v5423_v58  ;;  %v5472_v53 = vld [vmem:[#allocation7 + $0x950] ss:$8 sps:$4 sm:$0xff]   ;;  %v5477_v58 = vld [vmem:[#allocation7 + $0x494] ss:$8 sps:$4 sm:$0xff]  }
 0x1e0   :  { %4005 = vmatprep.subr.bf16.mxu1 %v5426_v60  ;;  %v5475_v60 = vld [vmem:[#allocation7 + $0x490] ss:$8 sps:$4 sm:$0xff]  }
 0x1e1   :  { %3807 = vmatmul.mubr.bf16.vlgmr.msra.gmra.mrb[32].mxu0 %v1219_v62  ;;  %v5486_v62 = vld [vmem:[#allocation7 + $0x974] ss:$8 sps:$4 sm:$0xff]  }
 0x1e2   :  { %3816 = vmatpush1.bf16.msra.mxu0 %v5421_v28  ;;  %3847 = vmatprep.mubr.bf16.mxu0 %v1222_v31  ;;  %v5478_v28 = vld [vmem:[#allocation7 + $0x960] ss:$8 sps:$4 sm:$0xff]   ;;  %v5489_v31 = vld [vmem:[#allocation7 + $0x4b4] ss:$8 sps:$4 sm:$0xff]  }
 0x1e3   :  { %4006 = vmatpush1.bf16.msra.mxu1 %v5424_v49  ;;  %3817 = vmatprep.subr.bf16.mxu0 %v5429_v63  ;;  %v5481_v49 = vld [vmem:[#allocation7 + $0x4a0] ss:$8 sps:$4 sm:$0xff]   ;;  %v5484_v63 = vld [vmem:[#allocation7 + $0x970] ss:$8 sps:$4 sm:$0xff]  }
 0x1e4   :  { %4007 = vmatprep.subr.bf16.mxu1 %v5432_v1  ;;  %v5492_v1 = vld [vmem:[#allocation7 + $0x984] ss:$8 sps:$4 sm:$0xff]  }
 0x1e6   :  { %3818 = vmatpush1.bf16.msra.mxu0 %v5427_v21  ;;  %v5495_v21 = vld [vmem:[#allocation7 + $0x4c4] ss:$8 sps:$4 sm:$0xff]  }
 0x1e7   :  { %4008 = vmatpush1.bf16.msra.mxu1 %v5430_v8  ;;  %3819 = vmatprep.subr.bf16.mxu0 %v5435_v9  ;;  %v5498_v8 = vld [vmem:[#allocation7 + $0x994] ss:$8 sps:$4 sm:$0xff]   ;;  %v5493_v9 = vld [vmem:[#allocation7 + $0x4c0] ss:$8 sps:$4 sm:$0xff]  }
 0x1e8   :  { %4009 = vmatprep.subr.bf16.mxu1 %v5438_v11  ;;  %v5496_v11 = vld [vmem:[#allocation7 + $0x990] ss:$8 sps:$4 sm:$0xff]  }
 0x1ea   :  { %3820 = vmatpush1.bf16.msra.mxu0 %v5433_v13  ;;  %v5499_v13 = vld [vmem:[#allocation7 + $0x4d0] ss:$8 sps:$4 sm:$0xff]  }
 0x1eb   :  { %4010 = vmatpush1.bf16.msra.mxu1 %v5436_v45  ;;  %3821 = vmatprep.subr.bf16.mxu0 %v5441_v14  ;;  %v184_v45 = vrot.slane %v5992_v39, %v5890_v23  ;;  %v5502_v14 = vld [vmem:[#allocation7 + $0x9a0] ss:$8 sps:$4 sm:$0xff]  }
 0x1ec   :  { %4020 = vmatprep.subr.bf16.mxu1 %v5444_v4  ;;  %v5507_v4 = vld [vmem:[#allocation7 + $0x4e4] ss:$8 sps:$4 sm:$0xff]   ;;  %v5514_v39 = vld [vmem:[#allocation7 + $0x9c0] ss:$8 sps:$4 sm:$0xff]  }
 0x1ee   :  { %4012 = vmatmul.mubr.bf16.vlgmr.msra.gmra.mrb[20].mxu1 %v1229_v18  ;;  %3822 = vmatpush1.bf16.msra.mxu0 %v5439_v5  ;;  %v5505_v18 = vld [vmem:[#allocation7 + $0x4e0] ss:$8 sps:$4 sm:$0xff]   ;;  %v855_v5 = vadd.f32 %v5927_v46, %v184_v45  ;;  %v5517_v46 = vld [vmem:[#allocation7 + $0x9d0] ss:$8 sps:$4 sm:$0xff]  }
 0x1ef   :  { %4021 = vmatpush1.bf16.msra.mxu1 %v5442_v25  ;;  %4052 = vmatprep.mubr.bf16.mxu1 %v1232_v57  ;;  %v5508_v25 = vld [vmem:[#allocation7 + $0x9b0] ss:$8 sps:$4 sm:$0xff]  }
 0x1f0   :  { %3823 = vmatprep.subr.bf16.mxu0 %v5447_v27  ;;  %4022 = vmatprep.subr.bf16.mxu1 %v5450_v29  ;;  %v5513_v27 = vld [vmem:[#allocation7 + $0x4f4] ss:$8 sps:$4 sm:$0xff]   ;;  %v5516_v29 = vld [vmem:[#allocation7 + $0x9c4] ss:$8 sps:$4 sm:$0xff]   ;;  %v5511_v57 = vld [vmem:[#allocation7 + $0x4f0] ss:$8 sps:$4 sm:$0xff]  }
 0x1f1   :  { %v5562_v45 = vld [vmem:[#allocation7 + $0xc70] ss:$8 sps:$4 sm:$0xff]  }
 0x1f2   :  { %3824 = vmatpush1.bf16.msra.mxu0 %v5445_v30  ;;  %v1196_v30 = vmax.f32 %v855_v5, 0.0  ;;  %v5565_v5 = vld [vmem:[#allocation7 + $0xa50] ss:$8 sps:$4 sm:$0xff]  }
 0x1f3   :  { %4023 = vmatpush1.bf16.msra.mxu1 %v5448_v33  ;;  %3825 = vmatprep.subr.bf16.mxu0 %v5453_v32  ;;  %v5522_v33 = vld [vmem:[#allocation7 + $0xc04] ss:$8 sps:$4 sm:$0xff]   ;;  %v5519_v32 = vld [vmem:[#allocation7 + $0x9d4] ss:$8 sps:$4 sm:$0xff]  }
 0x1f4   :  { %4024 = vmatprep.subr.bf16.mxu1 %v5456_v34  ;;  %v5520_v34 = vld [vmem:[#allocation7 + $0xc00] ss:$8 sps:$4 sm:$0xff]  }
 0x1f6   :  { %3826 = vmatpush1.bf16.msra.mxu0 %v5451_v35  ;;  %v1221_v35 = vpack.c.bf16 %v1196_v30, %v1196_v30  ;;  %v5574_v30 = vld [vmem:[#allocation7 + $0xa80] ss:$8 sps:$4 sm:$0xff]  }
 0x1f7   :  { %4025 = vmatpush1.bf16.msra.mxu1 %v5454_v36  ;;  %3827 = vmatprep.subr.bf16.mxu0 %v5459_v38  ;;  %v5528_v36 = vld [vmem:[#allocation7 + $0xc14] ss:$8 sps:$4 sm:$0xff]   ;;  %v224_v38 = vrot.slane %v5983_v3, %v5906_v42 }
 0x1f8   :  { %4026 = vmatprep.subr.bf16.mxu1 %v5462_v10  ;;  %v5525_v10 = vld [vmem:[#allocation7 + $0x9e4] ss:$8 sps:$4 sm:$0xff]  }
 0x1fa   :  { %3828 = vmatpush1.bf16.msra.mxu0 %v5457_v43  ;;  %v236_v43 = vrot.slane %v5983_v3, %v5936_v61  ;;  %v5540_v61 = vld [vmem:[#allocation7 + $0xc34] ss:$8 sps:$4 sm:$0xff]  }
 0x1fb   :  { %4027 = vmatpush1.bf16.msra.mxu1 %v5460_v44  ;;  %3829 = vmatprep.subr.bf16.mxu0 %v5465_v47  ;;  %v5526_v44 = vld [vmem:[#allocation7 + $0xc10] ss:$8 sps:$4 sm:$0xff]   ;;  %v5523_v47 = vld [vmem:[#allocation7 + $0x9e0] ss:$8 sps:$4 sm:$0xff]  }
 0x1fc   :  { %4028 = vmatprep.subr.bf16.mxu1 %v5468_v48  ;;  %v5534_v48 = vld [vmem:[#allocation7 + $0xc24] ss:$8 sps:$4 sm:$0xff]   ;;  %v1103_v42 = vadd.f32 %v5974_v41, %v236_v43  ;;  %v5589_v43 = vld [vmem:[#allocation7 + $0xad0] ss:$8 sps:$4 sm:$0xff]  }
 0x1fe   :  { %3830 = vmatpush1.bf16.msra.mxu0 %v5463_v15  ;;  %v1060_v15 = vadd.f32 %v5931_v55, %v224_v38  ;;  %v5586_v38 = vld [vmem:[#allocation7 + $0xac0] ss:$8 sps:$4 sm:$0xff]  }
 0x1ff   :  { %4029 = vmatpush1.bf16.msra.mxu1 %v5466_v50  ;;  %3831 = vmatprep.subr.bf16.mxu0 %v5471_v51  ;;  %v5531_v50 = vld [vmem:[#allocation7 + $0x9f4] ss:$8 sps:$4 sm:$0xff]   ;;  %v5532_v51 = vld [vmem:[#allocation7 + $0xc20] ss:$8 sps:$4 sm:$0xff]  }
 0x200   :  { %4030 = vmatprep.subr.bf16.mxu1 %v5474_v52  ;;  %v5529_v52 = vld [vmem:[#allocation7 + $0x9f0] ss:$8 sps:$4 sm:$0xff]  }
 0x202   :  { %3832 = vmatpush1.bf16.msra.mxu0 %v5469_v22  ;;  %v1206_v22 = vmax.f32 %v1060_v15, 0.0  ;;  %v5592_v15 = vld [vmem:[#allocation7 + $0xae0] ss:$8 sps:$4 sm:$0xff]  }
 0x203   :  { %4031 = vmatpush1.bf16.msra.mxu1 %v5472_v53  ;;  %3833 = vmatprep.subr.bf16.mxu0 %v5477_v58  ;;  %v5537_v53 = vld [vmem:[#allocation7 + $0xa04] ss:$8 sps:$4 sm:$0xff]   ;;  %v5538_v58 = vld [vmem:[#allocation7 + $0xc30] ss:$8 sps:$4 sm:$0xff]  }
 0x204   :  { %4032 = vmatprep.subr.bf16.mxu1 %v5480_v59  ;;  %v5535_v59 = vld [vmem:[#allocation7 + $0xa00] ss:$8 sps:$4 sm:$0xff]   ;;  %v1231_v55 = vpack.c.bf16 %v1206_v22, %v1206_v22  ;;  %v5600_v22 = vld [vmem:[#allocation7 + $0xb04] ss:$8 sps:$4 sm:$0xff]  }
 0x206   :  { %3834 = vmatpush1.bf16.msra.mxu0 %v5475_v60  ;;  %v5543_v60 = vld [vmem:[#allocation7 + $0xa14] ss:$8 sps:$4 sm:$0xff]  }
 0x207   :  { %4033 = vmatpush1.bf16.msra.mxu1 %v5478_v28  ;;  %3835 = vmatprep.subr.bf16.mxu0 %v5483_v17  ;;  %v5546_v28 = vld [vmem:[#allocation7 + $0xc44] ss:$8 sps:$4 sm:$0xff]   ;;  %v5544_v17 = vld [vmem:[#allocation7 + $0xc40] ss:$8 sps:$4 sm:$0xff]  }
 0x208   :  { %4034 = vmatprep.subr.bf16.mxu1 %v5486_v62  ;;  %v5541_v62 = vld [vmem:[#allocation7 + $0xa10] ss:$8 sps:$4 sm:$0xff]  }
 0x20a   :  { %3836 = vmatpush1.bf16.msra.mxu0 %v5481_v49  ;;  %v5552_v49 = vld [vmem:[#allocation7 + $0xc54] ss:$8 sps:$4 sm:$0xff]  }
 0x20b   :  { %4035 = vmatpush1.bf16.msra.mxu1 %v5484_v63  ;;  %3837 = vmatprep.subr.bf16.mxu0 %v5489_v31  ;;  %v144_v63 = vld [vmem:[#allocation2 + $0x60] ss:$4 sm:$0x1] }
 0x20c   :  { %4036 = vmatprep.subr.bf16.mxu1 %v5492_v1  ;;  %v5549_v31 = vld [vmem:[#allocation7 + $0xa24] ss:$8 sps:$4 sm:$0xff]   ;;  %v5550_v1 = vld [vmem:[#allocation7 + $0xc50] ss:$8 sps:$4 sm:$0xff]  }
 0x20e   :  { %3838 = vmatpush1.bf16.msra.mxu0 %v5487_v2  ;;  %v248_v2 = vrot.slane %v144_v63, %v5890_v23  ;;  %v5616_v63 = vld [vmem:[#allocation7 + $0xb60] ss:$8 sps:$4 sm:$0xff]  }
 0x20f   :  { %4037 = vmatpush1.bf16.msra.mxu1 %v5490_v7  ;;  %3839 = vmatprep.subr.bf16.mxu0 %v5495_v21  ;;  %v5547_v7 = vld [vmem:[#allocation7 + $0xa20] ss:$8 sps:$4 sm:$0xff]   ;;  %v5558_v21 = vld [vmem:[#allocation7 + $0xc64] ss:$8 sps:$4 sm:$0xff]  }
 0x210   :  { %4038 = vmatprep.subr.bf16.mxu1 %v5498_v8  ;;  %v5555_v8 = vld [vmem:[#allocation7 + $0xa34] ss:$8 sps:$4 sm:$0xff]  }
 0x212   :  { %3840 = vmatpush1.bf16.msra.mxu0 %v5493_v9  ;;  %v5556_v9 = vld [vmem:[#allocation7 + $0xc60] ss:$8 sps:$4 sm:$0xff]  }
 0x213   :  { %4039 = vmatpush1.bf16.msra.mxu1 %v5496_v11  ;;  %3841 = vmatprep.subr.bf16.mxu0 %v5501_v12  ;;  %v1183_v11 = vadd.f32 %v5985_v6, %v248_v2  ;;  %v5553_v12 = vld [vmem:[#allocation7 + $0xa30] ss:$8 sps:$4 sm:$0xff]   ;;  %v5570_v6 = vld [vmem:[#allocation7 + $0xa64] ss:$8 sps:$4 sm:$0xff]  }
 0x214   :  { %4040 = vmatprep.subr.bf16.mxu1 %v5504_v40  ;;  %v5564_v40 = vld [vmem:[#allocation7 + $0xc74] ss:$8 sps:$4 sm:$0xff]   ;;  %v5624_v2 = vld [vmem:[#allocation7 + $0xb84] ss:$8 sps:$4 sm:$0xff]  }
 0x216   :  { %3842 = vmatpush1.bf16.msra.mxu0 %v5499_v13  ;;  %v5561_v13 = vld [vmem:[#allocation7 + $0xa44] ss:$8 sps:$4 sm:$0xff]  }
 0x217   :  { %4041 = vmatpush1.bf16.msra.mxu1 %v5502_v14  ;;  %3843 = vmatprep.subr.bf16.mxu0 %v5507_v4  ;;  %v1212_v14 = vmax.f32 %v1183_v11, 0.0  ;;  %v5559_v4 = vld [vmem:[#allocation7 + $0xa40] ss:$8 sps:$4 sm:$0xff]  }
 0x218   :  { %4042 = vmatprep.subr.bf16.mxu1 %v5510_v16  ;;  %v5567_v16 = vld [vmem:[#allocation7 + $0xa54] ss:$8 sps:$4 sm:$0xff]   ;;  %v5628_v11 = vld [vmem:[#allocation7 + $0xba0] ss:$8 sps:$4 sm:$0xff]  }
 0x21a   :  { %3844 = vmatpush1.bf16.msra.mxu0 %v5505_v18  ;;  %v1237_v18 = vpack.c.bf16 %v1212_v14, %v1212_v14  ;;  %v5636_v14 = vld [vmem:[#allocation7 + $0xbc4] ss:$8 sps:$4 sm:$0xff]  }
 0x21b   :  { %4043 = vmatpush1.bf16.msra.mxu1 %v5508_v25  ;;  %3845 = vmatprep.subr.bf16.mxu0 %v5513_v27  ;;  %v5568_v25 = vld [vmem:[#allocation7 + $0xa60] ss:$8 sps:$4 sm:$0xff]   ;;  %v5573_v27 = vld [vmem:[#allocation7 + $0xa74] ss:$8 sps:$4 sm:$0xff]  }
 0x21c   :  { %4044 = vmatprep.subr.bf16.mxu1 %v5516_v29  ;;  %v5571_v29 = vld [vmem:[#allocation7 + $0xa70] ss:$8 sps:$4 sm:$0xff]  }
 0x21e   :  { %3846 = vmatpush1.bf16.msra.mxu0 %v5511_v57  ;;  %v5576_v57 = vld [vmem:[#allocation7 + $0xa84] ss:$8 sps:$4 sm:$0xff]  }
 0x21f   :  { %4045 = vmatpush1.bf16.msra.mxu1 %v5514_v39  ;;  %4143 = vmatprep.subr.bf16.mxu0 %v5522_v33  ;;  %v5579_v39 = vld [vmem:[#allocation7 + $0xa94] ss:$8 sps:$4 sm:$0xff]   ;;  %v5577_v33 = vld [vmem:[#allocation7 + $0xa90] ss:$8 sps:$4 sm:$0xff]  }
 0x220   :  { %4046 = vmatprep.subr.bf16.mxu1 %v5519_v32  ;;  %v5582_v32 = vld [vmem:[#allocation7 + $0xaa4] ss:$8 sps:$4 sm:$0xff]  }
 0x221   :  { %3848 = vmatmul.mubr.bf16.vlgmr.msra.gmra.mrb[32].mxu0 %v1221_v35  ;;  %v5585_v35 = vld [vmem:[#allocation7 + $0xab4] ss:$8 sps:$4 sm:$0xff]  }
 0x222   :  { %4144 = vmatpush1.bf16.msra.mxu0 %v5520_v34  ;;  %4175 = vmatprep.mubr.bf16.mxu0 %v5777_v0  ;;  %v1209_v0 = vmax.f32 %v1103_v42, 0.0  ;;  %v5580_v34 = vld [vmem:[#allocation7 + $0xaa0] ss:$8 sps:$4 sm:$0xff]   ;;  %v5597_v42 = vld [vmem:[#allocation7 + $0xaf4] ss:$8 sps:$4 sm:$0xff]  }
 0x223   :  { %4047 = vmatpush1.bf16.msra.mxu1 %v5517_v46  ;;  %4145 = vmatprep.subr.bf16.mxu0 %v5528_v36  ;;  %v5583_v46 = vld [vmem:[#allocation7 + $0xab0] ss:$8 sps:$4 sm:$0xff]   ;;  %v5588_v36 = vld [vmem:[#allocation7 + $0xac4] ss:$8 sps:$4 sm:$0xff]  }
 0x224   :  { %4048 = vmatprep.subr.bf16.mxu1 %v5525_v10  ;;  %v1234_v41 = vpack.c.bf16 %v1209_v0, %v1209_v0  ;;  %v5591_v10 = vld [vmem:[#allocation7 + $0xad4] ss:$8 sps:$4 sm:$0xff]  }
 0x226   :  { %4146 = vmatpush1.bf16.msra.mxu0 %v5526_v44  ;;  %v232_v44 = vrot.slane %v5983_v3, %v5953_v54  ;;  %v5598_v54 = vld [vmem:[#allocation7 + $0xb00] ss:$8 sps:$4 sm:$0xff]  }
 0x227   :  { %4049 = vmatpush1.bf16.msra.mxu1 %v5523_v47  ;;  %4147 = vmatprep.subr.bf16.mxu0 %v5534_v48  ;;  %v5594_v47 = vld [vmem:[#allocation7 + $0xae4] ss:$8 sps:$4 sm:$0xff]   ;;  %v244_v48 = vrot.slane %v5983_v3, %v5956_v56 }
 0x228   :  { %4050 = vmatprep.subr.bf16.mxu1 %v5531_v50  ;;  %v1101_v50 = vadd.f32 %v5970_v37, %v232_v44  ;;  %v5601_v37 = vld [vmem:[#allocation7 + $0xb10] ss:$8 sps:$4 sm:$0xff]  }
 0x22a   :  { %4148 = vmatpush1.bf16.msra.mxu0 %v5532_v51  ;;  %v1144_v51 = vadd.f32 %v5944_v26, %v244_v48  ;;  %v5604_v26 = vld [vmem:[#allocation7 + $0xb20] ss:$8 sps:$4 sm:$0xff]  }
 0x22b   :  { %4051 = vmatpush1.bf16.msra.mxu1 %v5529_v52  ;;  %4149 = vmatprep.subr.bf16.mxu0 %v5540_v61  ;;  %v5595_v52 = vld [vmem:[#allocation7 + $0xaf0] ss:$8 sps:$4 sm:$0xff]   ;;  %v1208_v61 = vmax.f32 %v1101_v50, 0.0  ;;  %v5669_v50 = vld [vmem:[#allocation7 + $0xcf4] ss:$8 sps:$4 sm:$0xff]  }
 0x22c   :  { %4061 = vmatprep.subr.bf16.mxu1 %v5537_v53  ;;  %v1211_v53 = vmax.f32 %v1144_v51, 0.0 }
 0x22d   :  { %v1233_v0 = vpack.c.bf16 %v1208_v61, %v1208_v61 }
 0x22e   :  { %4053 = vmatmul.mubr.bf16.vlgmr.msra.gmra.mrb[20].mxu1 %v1231_v55  ;;  %4150 = vmatpush1.bf16.msra.mxu0 %v5538_v58  ;;  %v5603_v58 = vld [vmem:[#allocation7 + $0xb14] ss:$8 sps:$4 sm:$0xff]   ;;  %v1236_v56 = vpack.c.bf16 %v1211_v53, %v1211_v53  ;;  %v1639_v53 = vld [vmem:[#allocation2 + $0x1] ss:$4 sm:$0x3] }
 0x22f   :  { %4062 = vmatpush1.bf16.msra.mxu1 %v5535_v59  ;;  %4093 = vmatprep.mubr.bf16.mxu1 %v1234_v41  ;;  %v5606_v59 = vld [vmem:[#allocation7 + $0xb24] ss:$8 sps:$4 sm:$0xff]   ;;  %v5609_v55 = vld [vmem:[#allocation7 + $0xb34] ss:$8 sps:$4 sm:$0xff]   ;;  %v5610_v41 = vld [vmem:[#allocation7 + $0xb40] ss:$8 sps:$4 sm:$0xff]  }
 0x230   :  { %4063 = vmatprep.subr.bf16.mxu1 %v5543_v60  ;;  %4151 = vmatprep.subr.bf16.mxu0 %v5546_v28  ;;  %v5607_v60 = vld [vmem:[#allocation7 + $0xb30] ss:$8 sps:$4 sm:$0xff]   ;;  %v5612_v28 = vld [vmem:[#allocation7 + $0xb44] ss:$8 sps:$4 sm:$0xff]  }
 0x232   :  { %4152 = vmatpush1.bf16.msra.mxu0 %v5544_v17  ;;  %v5615_v17 = vld [vmem:[#allocation7 + $0xb54] ss:$8 sps:$4 sm:$0xff]  }
 0x233   :  { %4064 = vmatpush1.bf16.msra.mxu1 %v5541_v62  ;;  %4153 = vmatprep.subr.bf16.mxu0 %v5552_v49  ;;  %v5613_v62 = vld [vmem:[#allocation7 + $0xb50] ss:$8 sps:$4 sm:$0xff]   ;;  %v5618_v49 = vld [vmem:[#allocation7 + $0xb64] ss:$8 sps:$4 sm:$0xff]  }
 0x234   :  { %4065 = vmatprep.subr.bf16.mxu1 %v5549_v31  ;;  %v5621_v31 = vld [vmem:[#allocation7 + $0xb74] ss:$8 sps:$4 sm:$0xff]  }
 0x236   :  { %4154 = vmatpush1.bf16.msra.mxu0 %v5550_v1  ;;  %v5619_v1 = vld [vmem:[#allocation7 + $0xb70] ss:$8 sps:$4 sm:$0xff]  }
 0x237   :  { %4066 = vmatpush1.bf16.msra.mxu1 %v5547_v7  ;;  %4155 = vmatprep.subr.bf16.mxu0 %v5558_v21  ;;  %v5622_v7 = vld [vmem:[#allocation7 + $0xb80] ss:$8 sps:$4 sm:$0xff]   ;;  %v5627_v21 = vld [vmem:[#allocation7 + $0xb94] ss:$8 sps:$4 sm:$0xff]  }
 0x238   :  { %4067 = vmatprep.subr.bf16.mxu1 %v5555_v8  ;;  %v5625_v8 = vld [vmem:[#allocation7 + $0xb90] ss:$8 sps:$4 sm:$0xff]  }
 0x23a   :  { %4156 = vmatpush1.bf16.msra.mxu0 %v5556_v9  ;;  %v5630_v9 = vld [vmem:[#allocation7 + $0xba4] ss:$8 sps:$4 sm:$0xff]  }
 0x23b   :  { %4068 = vmatpush1.bf16.msra.mxu1 %v5553_v12  ;;  %4157 = vmatprep.subr.bf16.mxu0 %v5564_v40  ;;  %v5633_v12 = vld [vmem:[#allocation7 + $0xbb4] ss:$8 sps:$4 sm:$0xff]   ;;  %v5631_v40 = vld [vmem:[#allocation7 + $0xbb0] ss:$8 sps:$4 sm:$0xff]  }
 0x23c   :  { %4069 = vmatprep.subr.bf16.mxu1 %v5561_v13  ;;  %v5646_v13 = vld [vmem:[#allocation7 + $0xc80] ss:$8 sps:$4 sm:$0xff]  }
 0x23e   :  { %4158 = vmatpush1.bf16.msra.mxu0 %v5562_v45  ;;  %v5648_v45 = vld [vmem:[#allocation7 + $0xc84] ss:$8 sps:$4 sm:$0xff]  }
 0x23f   :  { %4070 = vmatpush1.bf16.msra.mxu1 %v5559_v4  ;;  %v5651_v4 = vld [vmem:[#allocation7 + $0xc94] ss:$8 sps:$4 sm:$0xff]   ;;  %4289 = vmatprep.subr.bf16.mxu0 %v5648_v45 }
 0x240   :  { %4071 = vmatprep.subr.bf16.mxu1 %v5567_v16  ;;  %v5634_v16 = vld [vmem:[#allocation7 + $0xbc0] ss:$8 sps:$4 sm:$0xff]  }
 0x241   :  { %4176 = vmatmul.mubr.bf16.vlgmr.msra.gmra.mrb[36].mxu0 %v1237_v18  ;;  %v5639_v18 = vld [vmem:[#allocation7 + $0xbd4] ss:$8 sps:$4 sm:$0xff]  }
 0x243   :  { %4072 = vmatpush1.bf16.msra.mxu1 %v5565_v5  ;;  %v5649_v5 = vld [vmem:[#allocation7 + $0xc90] ss:$8 sps:$4 sm:$0xff]  }
 0x244   :  { %4073 = vmatprep.subr.bf16.mxu1 %v5570_v6  ;;  %v5637_v6 = vld [vmem:[#allocation7 + $0xbd0] ss:$8 sps:$4 sm:$0xff]  }
 0x247   :  { %4074 = vmatpush1.bf16.msra.mxu1 %v5568_v25  ;;  %4290 = vmatpush1.bf16.xpose.msra.mxu0 %v5646_v13  ;;  %v5654_v25 = vld [vmem:[#allocation7 + $0xca4] ss:$8 sps:$4 sm:$0xff]  }
 0x248   :  { %4075 = vmatprep.subr.bf16.mxu1 %v5573_v27  ;;  %4291 = vmatprep.subr.bf16.mxu0 %v5651_v4  ;;  %v240_v27 = vrot.slane %v5983_v3, %v5979_v20  ;;  %v5655_v3 = vld [vmem:[#allocation7 + $0xcb0] ss:$8 sps:$4 sm:$0xff]  }
 0x24b   :  { %4076 = vmatpush1.bf16.msra.mxu1 %v5571_v29  ;;  %v5642_v29 = vld [vmem:[#allocation7 + $0xbe4] ss:$8 sps:$4 sm:$0xff]  }
 0x24c   :  { %4077 = vmatprep.subr.bf16.mxu1 %v5576_v57  ;;  %v5640_v57 = vld [vmem:[#allocation7 + $0xbe0] ss:$8 sps:$4 sm:$0xff]  }
 0x24f   :  { %4078 = vmatpush1.bf16.msra.mxu1 %v5574_v30  ;;  %4292 = vmatpush1.bf16.xpose.msra.mxu0 %v5649_v5  ;;  %v1142_v30 = vadd.f32 %v5942_v19, %v240_v27  ;;  %v5661_v19 = vld [vmem:[#allocation7 + $0xcd0] ss:$8 sps:$4 sm:$0xff]  }
 0x250   :  { %4079 = vmatprep.subr.bf16.mxu1 %v5579_v39  ;;  %4293 = vmatprep.subr.bf16.mxu0 %v5654_v25  ;;  %v5645_v39 = vld [vmem:[#allocation7 + $0xbf4] ss:$8 sps:$4 sm:$0xff]  }
 0x253   :  { %4080 = vmatpush1.bf16.msra.mxu1 %v5577_v33  ;;  %v5652_v33 = vld [vmem:[#allocation7 + $0xca0] ss:$8 sps:$4 sm:$0xff]  }
 0x254   :  { %4081 = vmatprep.subr.bf16.mxu1 %v5582_v32  ;;  %v5643_v32 = vld [vmem:[#allocation7 + $0xbf0] ss:$8 sps:$4 sm:$0xff]  }
 0x257   :  { %4082 = vmatpush1.bf16.msra.mxu1 %v5580_v34  ;;  %v5657_v34 = vld [vmem:[#allocation7 + $0xcb4] ss:$8 sps:$4 sm:$0xff]   ;;  %4294 = vmatpush1.bf16.xpose.msra.mxu0 %v5652_v33 }
 0x258   :  { %4083 = vmatprep.subr.bf16.mxu1 %v5585_v35  ;;  %v1210_v35 = vmax.f32 %v1142_v30, 0.0  ;;  %4295 = vmatprep.subr.bf16.mxu0 %v5657_v34 }
 0x25a   :  { %v1235_v20 = vpack.c.bf16 %v1210_v35, %v1210_v35 }
 0x25b   :  { %4084 = vmatpush1.bf16.msra.mxu1 %v5583_v46  ;;  %v5660_v46 = vld [vmem:[#allocation7 + $0xcc4] ss:$8 sps:$4 sm:$0xff]  }
 0x25c   :  { %4085 = vmatprep.subr.bf16.mxu1 %v5588_v36  ;;  %v5658_v36 = vld [vmem:[#allocation7 + $0xcc0] ss:$8 sps:$4 sm:$0xff]  }
 0x25f   :  { %4086 = vmatpush1.bf16.msra.mxu1 %v5586_v38  ;;  %4296 = vmatpush1.bf16.xpose.msra.mxu0 %v5655_v3  ;;  %v5663_v38 = vld [vmem:[#allocation7 + $0xcd4] ss:$8 sps:$4 sm:$0xff]  }
 0x260   :  { %4087 = vmatprep.subr.bf16.mxu1 %v5591_v10  ;;  %4297 = vmatprep.subr.bf16.mxu0 %v5660_v46  ;;  %v5666_v10 = vld [vmem:[#allocation7 + $0xce4] ss:$8 sps:$4 sm:$0xff]  }
 0x263   :  { %4088 = vmatpush1.bf16.msra.mxu1 %v5589_v43  ;;  %v5664_v43 = vld [vmem:[#allocation7 + $0xce0] ss:$8 sps:$4 sm:$0xff]  }
 0x264   :  { %4089 = vmatprep.subr.bf16.mxu1 %v5594_v47 }
 0x267   :  { %4090 = vmatpush1.bf16.msra.mxu1 %v5592_v15  ;;  %4298 = vmatpush1.bf16.xpose.msra.mxu0 %v5658_v36 }
 0x268   :  { %4091 = vmatprep.subr.bf16.mxu1 %v5597_v42  ;;  %4299 = vmatprep.subr.bf16.mxu0 %v5663_v38  ;;  %v5667_v42 = vld [vmem:[#allocation7 + $0xcf0] ss:$8 sps:$4 sm:$0xff]  }
 0x26b   :  { %4092 = vmatpush1.bf16.msra.mxu1 %v5595_v52 }
 0x26c   :  { %4102 = vmatprep.subr.bf16.mxu1 %v5600_v22 }
 0x26e   :  { %4094 = vmatmul.mubr.bf16.vlgmr.msra.gmra.mrb[20].mxu1 %v1233_v0  ;;  %v1648_v0 = vrot.slane %v1639_v53, %v5893_v24 }
 0x26f   :  { %4103 = vmatpush1.bf16.msra.mxu1 %v5598_v54  ;;  %4134 = vmatprep.mubr.bf16.mxu1 %v1236_v56  ;;  %v1644_v54 = vrot.slane %v1639_v53, %v5890_v23 }
 0x270   :  { %4104 = vmatprep.subr.bf16.mxu1 %v5603_v58  ;;  %4300 = vmatpush1.bf16.xpose.msra.mxu0 %v5661_v19 }
 0x271   :  { %4301 = vmatprep.subr.bf16.mxu0 %v5666_v10 }
 0x273   :  { %4105 = vmatpush1.bf16.msra.mxu1 %v5601_v37 }
 0x274   :  { %4106 = vmatprep.subr.bf16.mxu1 %v5606_v59 }
 0x277   :  { %4107 = vmatpush1.bf16.msra.mxu1 %v5604_v26 }
 0x278   :  { %4108 = vmatprep.subr.bf16.mxu1 %v5609_v55  ;;  %4302 = vmatpush1.bf16.xpose.msra.mxu0 %v5664_v43 }
 0x279   :  { %4303 = vmatprep.subr.bf16.mxu0 %v5669_v50 }
 0x27b   :  { %4109 = vmatpush1.bf16.msra.mxu1 %v5607_v60 }
 0x27c   :  { %4110 = vmatprep.subr.bf16.mxu1 %v5612_v28 }
 0x27f   :  { %4111 = vmatpush1.bf16.msra.mxu1 %v5610_v41 }
 0x280   :  { %4112 = vmatprep.subr.bf16.mxu1 %v5615_v17  ;;  %4304 = vmatpush1.bf16.xpose.msra.mxu0 %v5667_v42 }
 0x283   :  { %4113 = vmatpush1.bf16.msra.mxu1 %v5613_v62 }
 0x284   :  { %4114 = vmatprep.subr.bf16.mxu1 %v5618_v49 }
 0x287   :  { %4115 = vmatpush1.bf16.msra.mxu1 %v5616_v63 }
 0x288   :  { %4116 = vmatprep.subr.bf16.mxu1 %v5621_v31 }
 0x28b   :  { %4117 = vmatpush1.bf16.msra.mxu1 %v5619_v1  ;;  %v4847_v1 = vld [vmem:[#allocation2 + $0x2] ss:$0 sm:$0xff] }
 0x28c   :  { %4118 = vmatprep.subr.bf16.mxu1 %v5624_v2 }
 0x28f   :  { %4119 = vmatpush1.bf16.msra.mxu1 %v5622_v7 }
 0x290   :  { %4120 = vmatprep.subr.bf16.mxu1 %v5627_v21 }
 0x293   :  { %4121 = vmatpush1.bf16.msra.mxu1 %v5625_v8 }
 0x294   :  { %4122 = vmatprep.subr.bf16.mxu1 %v5630_v9 }
 0x297   :  { %4123 = vmatpush1.bf16.msra.mxu1 %v5628_v11 }
 0x298   :  { %4124 = vmatprep.subr.bf16.mxu1 %v5633_v12 }
 0x29b   :  { %4125 = vmatpush1.bf16.msra.mxu1 %v5631_v40 }
 0x29c   :  { %4126 = vmatprep.subr.bf16.mxu1 %v5636_v14 }
 0x29f   :  { %4127 = vmatpush1.bf16.msra.mxu1 %v5634_v16 }
 0x2a0   :  { %4128 = vmatprep.subr.bf16.mxu1 %v5639_v18 }
 0x2a3   :  { %4129 = vmatpush1.bf16.msra.mxu1 %v5637_v6 }
 0x2a4   :  { %4130 = vmatprep.subr.bf16.mxu1 %v5642_v29 }
 0x2a7   :  { %4131 = vmatpush1.bf16.msra.mxu1 %v5640_v57 }
 0x2a8   :  { %4132 = vmatprep.subr.bf16.mxu1 %v5645_v39 }
 0x2ab   :  { %4133 = vmatpush1.bf16.msra.mxu1 %v5643_v32 }
 0x2ae   :  { %4135 = vmatmul.mubr.bf16.vlgmr.msra.gmra.mrb[20].mxu1 %v1235_v20 }
 0x2f4   :  { %v3849_v44 = vpop.f32.mrb[32].mxu0 }
 0x2f5   :  { %v3851_v47 = vpop.f32.mrb[33].mxu0  ;;  %v4878_v58 = vadd.f32 %v3849_v44, %v1644_v54 }
 0x2f6   :  { %v3853_v48 = vpop.f32.mrb[34].mxu0  ;;  %v4881_v56 = vadd.f32 %v3851_v47, %v1648_v0 }
 0x2f7   :  { %v3854_v15 = vpop.f32.mrb[35].mxu0 }
 0x314   :  { %v4177_v51 = vpop.f32.mrb[36].mxu0 }
 0x315   :  { %v4179_v52 = vpop.f32.mrb[37].mxu0 }
 0x316   :  { %v4181_v61 = vpop.f32.mrb[38].mxu0 }
 0x317   :  { %v4182_v22 = vpop.f32.mrb[39].mxu0 }
 0x381   :  { %v4136_v37 = vpop.f32.mrb[20].mxu1 }
 0x382   :  { %v4879_v59 = vadd.f32 %v4878_v58, %v4136_v37  ;;  %v4138_v26 = vpop.f32.mrb[21].mxu1 }
 0x383   :  { %v4882_v55 = vadd.f32 %v4881_v56, %v4138_v26  ;;  %v4140_v60 = vpop.f32.mrb[22].mxu1 }
 0x384   :  { %v4880_v28 = vadd.f32 %v4879_v59, %v4177_v51  ;;  %v4141_v41 = vpop.f32.mrb[23].mxu1 }
 0x385   :  { %v4883_v17 = vadd.f32 %v4882_v55, %v4179_v52 }
 0x386   :  { %v4184_v62 = vmax.f32 %v4880_v28, 0.0 }
 0x387   :  { %v4185_v49 = vmax.f32 %v4883_v17, 0.0 }
 0x388   :  { %v4202_v31 = vpack.c.bf16 %v4184_v62, %v4184_v62 }
 0x389   :  { %v4203_v63 = vpack.c.bf16 %v4185_v49, %v4185_v49 }
 0x38b   :  { %4321 = vmatprep.mubr.bf16.mxu0 %v4203_v63 }
 0x38c   :  { %4322 = vmatmul.mubr.bf16.vlgmr.msra.gmra.mrb[40].mxu0 %v4202_v31 }
 0x45f   :  { %v4323_v23 = vpop.f32.mrb[40].mxu0 }
 0x460   :  { %v4324_v24 = vadd.f32 %v4847_v1, %v4323_v23  ;;  %v4325_v2 = vpop.f32.mrb[41].mxu0 }
 0x461   :  { %v4326_v7 = vpop.f32.mrb[42].mxu0 }
 0x462   :  { %v4327_v21 = vpop.f32.mrb[43].mxu0  ;;  %v4330_v8 = vsel %vm4329_vm2, %v4324_v24, -inf }
 0x463   :  { %4331 = vmax.xlane.f32.xlu0 %v4330_v8 }
 0x4f0   :  { %v4332_v9 = vpop.xlane.xlu0 %4331 }
 0x4f1   :  { %v4333_v11 = vsub.f32 %v4324_v24, %v4332_v9 }
 0x4f3   :  { %v4334_v12 = vmul.f32 1.442695, %v4333_v11 }
 0x4f5   :  { %5670 = vpow2.f32 %v4334_v12 }
 0x4ff   :  { %v5671_v40 = vpop.eup %5670 }
 0x500   :  { %v4336_v13 = vsel %vm4329_vm2, %v5671_v40, 0.0 }
 0x501   :  { %4337 = vadd.xlane.f32.xlu0 %v4336_v13 }
 0x58e   :  { %v4338_v45 = vpop.xlane.xlu0 %4337 }
 0x58f   :  { %5672 = vrcp.f32 %v4338_v45 }
 0x599   :  { %v5673_v14 = vpop.eup %5672 }
 0x59a   :  { %v4340_v4 = vmul.f32 %v5673_v14, %v5671_v40 }
 0x59c   :  { %4342 = vst.msk [vmem:[#allocation8] sm:$0x3] %vm4341_vm3, %v4340_v4 }
 0x59d   :  { %5753 = shalt.err (!%p5750_p0)
}
 0x59e   :  { %s5754_s6 = scalar_lea.hbm %s6043_s4, 32 }
 0x59f   :  { %p5755_p1 = scmp.ne.s32.totalorder %s6043_s4, %s5754_s6  ;;  %p5758_p2 = scmp.lt.u32.totalorder %s5754_s6, %s6043_s4 }
 0x5a1   :  { %p5760_p3 = pnand %p5758_p2, %p5755_p1 }
 0x5a3   :  { %5763 = shalt.err (!%p5760_p3)
}
 0x5a4   :  { %4352 = dma.vmem_to_hbm [thread:$0]  %s4350_s28, 32, %s6043_s4, [#allocation4]  }
 0x5a5   :  { %5768 = dma.done.wait [#allocation4], 32  }
 0x5a6   :  { %5769 = vsyncadd [#allocation4], 4294967264 }
 0x5a7   :  { %4356 = vsyncpa [#allocation3], 1 }
 0x5a8   :  { %4357 = vsyncpa [#allocation6], 1 }
 0x5a9   :  { %4358 = vsyncpa [#allocation4], 1 }

</bundles_post_ra>
